<compile_context>
chip_gen: v7x
topology: tpu7x:2x2x1
jax: 0.10.0
libtpu: 0.0.40
codegen_flags: <defaults>
</compile_context>

<pallas_src>
import functools

import jax
import jax.numpy as jnp
import numpy as np
from jax.experimental import pallas as pl
from jax.experimental.pallas import tpu as pltpu


def _round_up(a, m):
    return ((a + m - 1) // m) * m


def _choose_batch_tile(b, n, d, itemsize, max_tile=1024, target_x_tile_bytes=3 << 20):
    """Pick a batch tile that is a multiple of 128, divides the (128-padded)
    batch, and keeps one x tile around a few MiB (it gets double-buffered)."""
    b128 = _round_up(b, 128) // 128                     # 128-row groups
    bytes_per_128_rows = 128 * n * d * itemsize
    g_cap = max(1, min(max_tile // 128,
                       max(1, target_x_tile_bytes // max(1, bytes_per_128_rows))))
    g = 1
    for cand in range(1, min(b128, g_cap) + 1):
        if b128 % cand == 0:
            g = cand
    return 128 * g, 128 * b128                          # (tile, padded batch)


def _sdt_kernel(wt_ref, x_ref, o_ref, *, n_nodes, d):
    """One batch tile.

    wt_ref : (N_pad, TB)   weight, transposed so batch lies on the 128 lanes
    x_ref  : (TB, N*D)     features, flattened so node n occupies lanes [n*D, (n+1)*D)
    o_ref  : (TB, D)       output
    """
    n_pad, tb = wt_ref.shape

    wt = wt_ref[...].astype(jnp.float32)                        # (N_pad, TB)

    # ---------------- entmax-1.5 over the node axis (sublanes) ----------------
    # Stabilize and halve (entmax15 convention).  Padded node rows hold -inf so
    # they never affect the max / ranks and end up with probability 0.
    z = (wt - jnp.max(wt, axis=0, keepdims=True)) * 0.5          # (N_pad, TB)

    # Exact descending ranks with index tie-break — pure VPU compares, no
    # reductions:  rank[i] = #{j : z[j] > z[i]  or  (z[j] == z[i] and j < i)}.
    # TODO(synk): for large N (>=16) switch these unrolled loops to
    #             lax.fori_loop(..., unroll=True) to bound vreg live ranges.
    row = jax.lax.broadcasted_iota(jnp.int32, (n_pad, tb), 0)
    rank = jnp.zeros((n_pad, tb), jnp.int32)
    for j in range(n_nodes):
        zj = z[j:j + 1, :]                                       # (1, TB) sublane bcast
        rank = rank + ((zj > z) | ((zj == z) & (row > j))).astype(jnp.int32)

    # Sorted-threshold algorithm: one sublane-sum reduction per k extracts the
    # k-th largest value exactly (ranks are unique per column).
    sum1 = jnp.zeros((1, tb), jnp.float32)
    sum2 = jnp.zeros((1, tb), jnp.float32)
    tau_star = jnp.zeros((1, tb), jnp.float32)
    for k in range(1, n_nodes + 1):
        z_k = jnp.sum(jnp.where(rank == (k - 1), z, 0.0), axis=0, keepdims=True)
        sum1 = sum1 + z_k
        sum2 = sum2 + z_k * z_k
        kf = jnp.float32(k)
        mean = sum1 / kf
        ss = sum2 - sum1 * mean
        delta = (1.0 - ss) / kf
        tau = mean - jnp.sqrt(jnp.maximum(delta, 0.0))
        # support condition holds for a prefix of k; keep the last tau that holds
        tau_star = jnp.where(tau <= z_k, tau, tau_star)

    p = jnp.square(jnp.maximum(z - tau_star, 0.0))               # (N_pad, TB) probs
    # One small native-tile transpose (8k x 128m) so batch maps to sublanes for
    # the decision reduce.
    p_bt = jnp.transpose(p)                                      # (TB, N_pad)

    # ----- decision layer einsum('bn,bnd->bd') as a per-node accumulation -----
    # Only a (TB, D) accumulator stays live; x slices are cast per node.
    acc = p_bt[:, 0:1] * x_ref[:, 0:d].astype(jnp.float32)
    for i in range(1, n_nodes):
        acc = acc + p_bt[:, i:i + 1] * x_ref[:, i * d:(i + 1) * d].astype(jnp.float32)
    o_ref[...] = acc.astype(o_ref.dtype)


def slide_decision_tree(x, weight, *, block_b=None):
    """x: (B, N, D), weight: (B, N) -> (B, D).  Forward of SlideDecisionTree."""
    B, N, D = x.shape
    assert weight.shape == (B, N)

    n_pad = _round_up(N, 8)                      # sublane-friendly node count

    if block_b is None:
        tb, b_pad = _choose_batch_tile(B, N, D, jnp.dtype(x.dtype).itemsize)
    else:
        tb = int(block_b)
        assert tb % 128 == 0, "block_b must be a multiple of 128"
        b_pad = _round_up(B, tb)

    # --- wrapper-side layout plumbing (all tiny except a possible x batch pad) ---
    w = weight
    if n_pad != N:
        # padded tree nodes get -inf so they rank last and get probability 0
        w = jnp.pad(w, ((0, 0), (0, n_pad - N)), constant_values=-jnp.inf)
    if b_pad != B:
        # TODO(synk): keep production batch sizes a multiple of 128 to avoid this x copy.
        w = jnp.pad(w, ((0, b_pad - B), (0, 0)))
        x = jnp.pad(x, ((0, b_pad - B), (0, 0), (0, 0)))
    wt = jnp.transpose(w)                        # (n_pad, b_pad): batch on lanes
    x2 = x.reshape(b_pad, N * D)                 # free reshape of contiguous dims

    # NOTE: for best store efficiency D should be a multiple of 128 in
    # production (lane-dense output); a full-dim block keeps small D legal.
    kernel = functools.partial(_sdt_kernel, n_nodes=N, d=D)
    out = pl.pallas_call(
        kernel,
        out_shape=jax.ShapeDtypeStruct((b_pad, D), x.dtype),
        grid=(b_pad // tb,),
        in_specs=[
            pl.BlockSpec((n_pad, tb), lambda i: (0, i)),    # weight^T tile
            pl.BlockSpec((tb, N * D), lambda i: (i, 0)),    # x tile (flattened)
        ],
        out_specs=pl.BlockSpec((tb, D), lambda i: (i, 0)),
        compiler_params=pltpu.CompilerParams(
            dimension_semantics=("parallel",),              # megacore: split batch tiles
            vmem_limit_bytes=32 * 1024 * 1024,              # >= v5e's 16 MiB default
        ),
    )(wt, x2)
    return out[:B] if b_pad != B else out


# ----------------------------- pure-JAX reference -----------------------------
def _entmax15_ref(z):
    z = (z - jnp.max(z, axis=-1, keepdims=True)) * 0.5
    zs = jnp.sort(z, axis=-1)[..., ::-1]
    rho = jnp.arange(1, z.shape[-1] + 1, dtype=z.dtype)
    mean = jnp.cumsum(zs, axis=-1) / rho
    mean_sq = jnp.cumsum(zs * zs, axis=-1) / rho
    ss = rho * (mean_sq - mean * mean)
    delta = (1.0 - ss) / rho
    tau = mean - jnp.sqrt(jnp.clip(delta, 0.0))
    support = jnp.sum((tau <= zs).astype(jnp.int32), axis=-1)
    tau_star = jnp.take_along_axis(tau, (support - 1)[..., None], axis=-1)
    return jnp.clip(z - tau_star, 0.0) ** 2


def _ref_forward(x, weight):
    p = _entmax15_ref(weight)
    return jnp.einsum("bn,bnd->bd", p, x)


if __name__ == "__main__":
    key = jax.random.PRNGKey(0)
    k1, k2, k3, k4 = jax.random.split(key, 4)

    # Small shapes consistent with the module: batch=2, tree nodes=8, hidden=32.
    B, N, D = 2, 8, 32
    weight = jax.random.normal(k1, (B, N), dtype=jnp.float32)
    x = jax.random.normal(k2, (B, N, D), dtype=jnp.float32)
    out = jax.block_until_ready(slide_decision_tree(x, weight))
    ref = jax.block_until_ready(_ref_forward(x, weight))
    np.testing.assert_allclose(np.asarray(out), np.asarray(ref), rtol=1e-5, atol=1e-5)

    # Larger batch to exercise the tiled / pipelined path (grid of 4 batch tiles).
    B2, N2, D2 = 512, 8, 128
    weight2 = jax.random.normal(k3, (B2, N2), dtype=jnp.float32)
    x2 = jax.random.normal(k4, (B2, N2, D2), dtype=jnp.float32)
    out2 = jax.block_until_ready(slide_decision_tree(x2, weight2, block_b=128))
    ref2 = jax.block_until_ready(_ref_forward(x2, weight2))
    np.testing.assert_allclose(np.asarray(out2), np.asarray(ref2), rtol=1e-4, atol=1e-4)

    print("KERNEL_OK")
</pallas_src>

<mosaic_0001>
module attributes {stable_mosaic.version = 11 : i64} {
  func.func @_sdt_kernel(%arg0: i32, %arg1: memref<8x128xf32, #tpu.memory_space<vmem>>, %arg2: memref<128x256xf32, #tpu.memory_space<vmem>>, %arg3: memref<128x32xf32, #tpu.memory_space<vmem>>) attributes {dimension_semantics = [#tpu.dimension_semantics<parallel>], iteration_bounds = array<i64: 1>, scalar_prefetch = 0 : i64, scratch_operands = 0 : i64, tpu.core_type = #tpu.core_type<tc>, window_params = [{transform_indices = @transform_0, window_bounds = array<i64: 8, 128>}, {transform_indices = @transform_1, window_bounds = array<i64: 128, 256>}, {transform_indices = @transform_2, window_bounds = array<i64: 128, 32>}]} {
    %c0 = arith.constant 0 : index
    %c0_0 = arith.constant 0 : index
    %0 = vector.load %arg1[%c0, %c0_0] : memref<8x128xf32, #tpu.memory_space<vmem>>, vector<8x128xf32>
    %cst = arith.constant dense<0xFF800000> : vector<128xf32>
    %1 = vector.multi_reduction <maximumf>, %0, %cst [0] : vector<8x128xf32> to vector<128xf32>
    %2 = vector.shape_cast %1 : vector<128xf32> to vector<1x128xf32>
    %3 = vector.broadcast %2 : vector<1x128xf32> to vector<8x128xf32>
    %4 = arith.subf %0, %3 : vector<8x128xf32>
    %cst_1 = arith.constant 5.000000e-01 : f32
    %5 = vector.broadcast %cst_1 : f32 to vector<8x128xf32>
    %6 = arith.mulf %4, %5 : vector<8x128xf32>
    %7 = tpu.iota {dimensions = array<i32: 0>} : vector<8x128xi32>
    %c0_i32 = arith.constant 0 : i32
    %8 = vector.broadcast %c0_i32 : i32 to vector<8x128xi32>
    %9 = vector.extract_strided_slice %6 {offsets = [0, 0], sizes = [1, 128], strides = [1, 1]} : vector<8x128xf32> to vector<1x128xf32>
    %10 = vector.broadcast %9 : vector<1x128xf32> to vector<8x128xf32>
    %11 = arith.cmpf ogt, %10, %6 : vector<8x128xf32>
    %12 = vector.broadcast %9 : vector<1x128xf32> to vector<8x128xf32>
    %13 = arith.cmpf oeq, %12, %6 : vector<8x128xf32>
    %c0_i32_2 = arith.constant 0 : i32
    %14 = vector.broadcast %c0_i32_2 : i32 to vector<8x128xi32>
    %15 = arith.cmpi sgt, %7, %14 : vector<8x128xi32>
    %16 = arith.andi %13, %15 : vector<8x128xi1>
    %17 = arith.ori %11, %16 : vector<8x128xi1>
    %18 = arith.extui %17 : vector<8x128xi1> to vector<8x128xi32>
    %19 = arith.addi %8, %18 : vector<8x128xi32>
    %20 = vector.extract_strided_slice %6 {offsets = [1, 0], sizes = [1, 128], strides = [1, 1]} : vector<8x128xf32> to vector<1x128xf32>
    %21 = vector.broadcast %20 : vector<1x128xf32> to vector<8x128xf32>
    %22 = arith.cmpf ogt, %21, %6 : vector<8x128xf32>
    %23 = vector.broadcast %20 : vector<1x128xf32> to vector<8x128xf32>
    %24 = arith.cmpf oeq, %23, %6 : vector<8x128xf32>
    %c1_i32 = arith.constant 1 : i32
    %25 = vector.broadcast %c1_i32 : i32 to vector<8x128xi32>
    %26 = arith.cmpi sgt, %7, %25 : vector<8x128xi32>
    %27 = arith.andi %24, %26 : vector<8x128xi1>
    %28 = arith.ori %22, %27 : vector<8x128xi1>
    %29 = arith.extui %28 : vector<8x128xi1> to vector<8x128xi32>
    %30 = arith.addi %19, %29 : vector<8x128xi32>
    %31 = vector.extract_strided_slice %6 {offsets = [2, 0], sizes = [1, 128], strides = [1, 1]} : vector<8x128xf32> to vector<1x128xf32>
    %32 = vector.broadcast %31 : vector<1x128xf32> to vector<8x128xf32>
    %33 = arith.cmpf ogt, %32, %6 : vector<8x128xf32>
    %34 = vector.broadcast %31 : vector<1x128xf32> to vector<8x128xf32>
    %35 = arith.cmpf oeq, %34, %6 : vector<8x128xf32>
    %c2_i32 = arith.constant 2 : i32
    %36 = vector.broadcast %c2_i32 : i32 to vector<8x128xi32>
    %37 = arith.cmpi sgt, %7, %36 : vector<8x128xi32>
    %38 = arith.andi %35, %37 : vector<8x128xi1>
    %39 = arith.ori %33, %38 : vector<8x128xi1>
    %40 = arith.extui %39 : vector<8x128xi1> to vector<8x128xi32>
    %41 = arith.addi %30, %40 : vector<8x128xi32>
    %42 = vector.extract_strided_slice %6 {offsets = [3, 0], sizes = [1, 128], strides = [1, 1]} : vector<8x128xf32> to vector<1x128xf32>
    %43 = vector.broadcast %42 : vector<1x128xf32> to vector<8x128xf32>
    %44 = arith.cmpf ogt, %43, %6 : vector<8x128xf32>
    %45 = vector.broadcast %42 : vector<1x128xf32> to vector<8x128xf32>
    %46 = arith.cmpf oeq, %45, %6 : vector<8x128xf32>
    %c3_i32 = arith.constant 3 : i32
    %47 = vector.broadcast %c3_i32 : i32 to vector<8x128xi32>
    %48 = arith.cmpi sgt, %7, %47 : vector<8x128xi32>
    %49 = arith.andi %46, %48 : vector<8x128xi1>
    %50 = arith.ori %44, %49 : vector<8x128xi1>
    %51 = arith.extui %50 : vector<8x128xi1> to vector<8x128xi32>
    %52 = arith.addi %41, %51 : vector<8x128xi32>
    %53 = vector.extract_strided_slice %6 {offsets = [4, 0], sizes = [1, 128], strides = [1, 1]} : vector<8x128xf32> to vector<1x128xf32>
    %54 = vector.broadcast %53 : vector<1x128xf32> to vector<8x128xf32>
    %55 = arith.cmpf ogt, %54, %6 : vector<8x128xf32>
    %56 = vector.broadcast %53 : vector<1x128xf32> to vector<8x128xf32>
    %57 = arith.cmpf oeq, %56, %6 : vector<8x128xf32>
    %c4_i32 = arith.constant 4 : i32
    %58 = vector.broadcast %c4_i32 : i32 to vector<8x128xi32>
    %59 = arith.cmpi sgt, %7, %58 : vector<8x128xi32>
    %60 = arith.andi %57, %59 : vector<8x128xi1>
    %61 = arith.ori %55, %60 : vector<8x128xi1>
    %62 = arith.extui %61 : vector<8x128xi1> to vector<8x128xi32>
    %63 = arith.addi %52, %62 : vector<8x128xi32>
    %64 = vector.extract_strided_slice %6 {offsets = [5, 0], sizes = [1, 128], strides = [1, 1]} : vector<8x128xf32> to vector<1x128xf32>
    %65 = vector.broadcast %64 : vector<1x128xf32> to vector<8x128xf32>
    %66 = arith.cmpf ogt, %65, %6 : vector<8x128xf32>
    %67 = vector.broadcast %64 : vector<1x128xf32> to vector<8x128xf32>
    %68 = arith.cmpf oeq, %67, %6 : vector<8x128xf32>
    %c5_i32 = arith.constant 5 : i32
    %69 = vector.broadcast %c5_i32 : i32 to vector<8x128xi32>
    %70 = arith.cmpi sgt, %7, %69 : vector<8x128xi32>
    %71 = arith.andi %68, %70 : vector<8x128xi1>
    %72 = arith.ori %66, %71 : vector<8x128xi1>
    %73 = arith.extui %72 : vector<8x128xi1> to vector<8x128xi32>
    %74 = arith.addi %63, %73 : vector<8x128xi32>
    %75 = vector.extract_strided_slice %6 {offsets = [6, 0], sizes = [1, 128], strides = [1, 1]} : vector<8x128xf32> to vector<1x128xf32>
    %76 = vector.broadcast %75 : vector<1x128xf32> to vector<8x128xf32>
    %77 = arith.cmpf ogt, %76, %6 : vector<8x128xf32>
    %78 = vector.broadcast %75 : vector<1x128xf32> to vector<8x128xf32>
    %79 = arith.cmpf oeq, %78, %6 : vector<8x128xf32>
    %c6_i32 = arith.constant 6 : i32
    %80 = vector.broadcast %c6_i32 : i32 to vector<8x128xi32>
    %81 = arith.cmpi sgt, %7, %80 : vector<8x128xi32>
    %82 = arith.andi %79, %81 : vector<8x128xi1>
    %83 = arith.ori %77, %82 : vector<8x128xi1>
    %84 = arith.extui %83 : vector<8x128xi1> to vector<8x128xi32>
    %85 = arith.addi %74, %84 : vector<8x128xi32>
    %86 = vector.extract_strided_slice %6 {offsets = [7, 0], sizes = [1, 128], strides = [1, 1]} : vector<8x128xf32> to vector<1x128xf32>
    %87 = vector.broadcast %86 : vector<1x128xf32> to vector<8x128xf32>
    %88 = arith.cmpf ogt, %87, %6 : vector<8x128xf32>
    %89 = vector.broadcast %86 : vector<1x128xf32> to vector<8x128xf32>
    %90 = arith.cmpf oeq, %89, %6 : vector<8x128xf32>
    %c7_i32 = arith.constant 7 : i32
    %91 = vector.broadcast %c7_i32 : i32 to vector<8x128xi32>
    %92 = arith.cmpi sgt, %7, %91 : vector<8x128xi32>
    %93 = arith.andi %90, %92 : vector<8x128xi1>
    %94 = arith.ori %88, %93 : vector<8x128xi1>
    %95 = arith.extui %94 : vector<8x128xi1> to vector<8x128xi32>
    %96 = arith.addi %85, %95 : vector<8x128xi32>
    %cst_3 = arith.constant 0.000000e+00 : f32
    %97 = vector.broadcast %cst_3 : f32 to vector<1x128xf32>
    %cst_4 = arith.constant 0.000000e+00 : f32
    %98 = vector.broadcast %cst_4 : f32 to vector<1x128xf32>
    %cst_5 = arith.constant 0.000000e+00 : f32
    %99 = vector.broadcast %cst_5 : f32 to vector<1x128xf32>
    %c0_i32_6 = arith.constant 0 : i32
    %100 = vector.broadcast %c0_i32_6 : i32 to vector<8x128xi32>
    %101 = arith.cmpi eq, %96, %100 : vector<8x128xi32>
    %cst_7 = arith.constant 0.000000e+00 : f32
    %102 = vector.broadcast %cst_7 : f32 to vector<8x128xf32>
    %103 = arith.select %101, %6, %102 : vector<8x128xi1>, vector<8x128xf32>
    %cst_8 = arith.constant dense<0.000000e+00> : vector<128xf32>
    %104 = vector.multi_reduction <add>, %103, %cst_8 [0] : vector<8x128xf32> to vector<128xf32>
    %105 = vector.shape_cast %104 : vector<128xf32> to vector<1x128xf32>
    %106 = arith.addf %97, %105 : vector<1x128xf32>
    %107 = arith.mulf %105, %105 : vector<1x128xf32>
    %108 = arith.addf %98, %107 : vector<1x128xf32>
    %cst_9 = arith.constant 1.000000e+00 : f32
    %109 = vector.broadcast %cst_9 : f32 to vector<1x128xf32>
    %110 = arith.divf %106, %109 : vector<1x128xf32>
    %111 = arith.mulf %106, %110 : vector<1x128xf32>
    %112 = arith.subf %108, %111 : vector<1x128xf32>
    %cst_10 = arith.constant 1.000000e+00 : f32
    %113 = vector.broadcast %cst_10 : f32 to vector<1x128xf32>
    %114 = arith.subf %113, %112 : vector<1x128xf32>
    %cst_11 = arith.constant 1.000000e+00 : f32
    %115 = vector.broadcast %cst_11 : f32 to vector<1x128xf32>
    %116 = arith.divf %114, %115 : vector<1x128xf32>
    %cst_12 = arith.constant 0.000000e+00 : f32
    %117 = vector.broadcast %cst_12 : f32 to vector<1x128xf32>
    %118 = arith.maximumf %116, %117 : vector<1x128xf32>
    %119 = math.sqrt %118 : vector<1x128xf32>
    %120 = arith.subf %110, %119 : vector<1x128xf32>
    %121 = arith.cmpf ole, %120, %105 : vector<1x128xf32>
    %122 = arith.select %121, %120, %99 : vector<1x128xi1>, vector<1x128xf32>
    %c1_i32_13 = arith.constant 1 : i32
    %123 = vector.broadcast %c1_i32_13 : i32 to vector<8x128xi32>
    %124 = arith.cmpi eq, %96, %123 : vector<8x128xi32>
    %cst_14 = arith.constant 0.000000e+00 : f32
    %125 = vector.broadcast %cst_14 : f32 to vector<8x128xf32>
    %126 = arith.select %124, %6, %125 : vector<8x128xi1>, vector<8x128xf32>
    %cst_15 = arith.constant dense<0.000000e+00> : vector<128xf32>
    %127 = vector.multi_reduction <add>, %126, %cst_15 [0] : vector<8x128xf32> to vector<128xf32>
    %128 = vector.shape_cast %127 : vector<128xf32> to vector<1x128xf32>
    %129 = arith.addf %106, %128 : vector<1x128xf32>
    %130 = arith.mulf %128, %128 : vector<1x128xf32>
    %131 = arith.addf %108, %130 : vector<1x128xf32>
    %cst_16 = arith.constant 2.000000e+00 : f32
    %132 = vector.broadcast %cst_16 : f32 to vector<1x128xf32>
    %133 = arith.divf %129, %132 : vector<1x128xf32>
    %134 = arith.mulf %129, %133 : vector<1x128xf32>
    %135 = arith.subf %131, %134 : vector<1x128xf32>
    %cst_17 = arith.constant 1.000000e+00 : f32
    %136 = vector.broadcast %cst_17 : f32 to vector<1x128xf32>
    %137 = arith.subf %136, %135 : vector<1x128xf32>
    %cst_18 = arith.constant 2.000000e+00 : f32
    %138 = vector.broadcast %cst_18 : f32 to vector<1x128xf32>
    %139 = arith.divf %137, %138 : vector<1x128xf32>
    %cst_19 = arith.constant 0.000000e+00 : f32
    %140 = vector.broadcast %cst_19 : f32 to vector<1x128xf32>
    %141 = arith.maximumf %139, %140 : vector<1x128xf32>
    %142 = math.sqrt %141 : vector<1x128xf32>
    %143 = arith.subf %133, %142 : vector<1x128xf32>
    %144 = arith.cmpf ole, %143, %128 : vector<1x128xf32>
    %145 = arith.select %144, %143, %122 : vector<1x128xi1>, vector<1x128xf32>
    %c2_i32_20 = arith.constant 2 : i32
    %146 = vector.broadcast %c2_i32_20 : i32 to vector<8x128xi32>
    %147 = arith.cmpi eq, %96, %146 : vector<8x128xi32>
    %cst_21 = arith.constant 0.000000e+00 : f32
    %148 = vector.broadcast %cst_21 : f32 to vector<8x128xf32>
    %149 = arith.select %147, %6, %148 : vector<8x128xi1>, vector<8x128xf32>
    %cst_22 = arith.constant dense<0.000000e+00> : vector<128xf32>
    %150 = vector.multi_reduction <add>, %149, %cst_22 [0] : vector<8x128xf32> to vector<128xf32>
    %151 = vector.shape_cast %150 : vector<128xf32> to vector<1x128xf32>
    %152 = arith.addf %129, %151 : vector<1x128xf32>
    %153 = arith.mulf %151, %151 : vector<1x128xf32>
    %154 = arith.addf %131, %153 : vector<1x128xf32>
    %cst_23 = arith.constant 3.000000e+00 : f32
    %155 = vector.broadcast %cst_23 : f32 to vector<1x128xf32>
    %156 = arith.divf %152, %155 : vector<1x128xf32>
    %157 = arith.mulf %152, %156 : vector<1x128xf32>
    %158 = arith.subf %154, %157 : vector<1x128xf32>
    %cst_24 = arith.constant 1.000000e+00 : f32
    %159 = vector.broadcast %cst_24 : f32 to vector<1x128xf32>
    %160 = arith.subf %159, %158 : vector<1x128xf32>
    %cst_25 = arith.constant 3.000000e+00 : f32
    %161 = vector.broadcast %cst_25 : f32 to vector<1x128xf32>
    %162 = arith.divf %160, %161 : vector<1x128xf32>
    %cst_26 = arith.constant 0.000000e+00 : f32
    %163 = vector.broadcast %cst_26 : f32 to vector<1x128xf32>
    %164 = arith.maximumf %162, %163 : vector<1x128xf32>
    %165 = math.sqrt %164 : vector<1x128xf32>
    %166 = arith.subf %156, %165 : vector<1x128xf32>
    %167 = arith.cmpf ole, %166, %151 : vector<1x128xf32>
    %168 = arith.select %167, %166, %145 : vector<1x128xi1>, vector<1x128xf32>
    %c3_i32_27 = arith.constant 3 : i32
    %169 = vector.broadcast %c3_i32_27 : i32 to vector<8x128xi32>
    %170 = arith.cmpi eq, %96, %169 : vector<8x128xi32>
    %cst_28 = arith.constant 0.000000e+00 : f32
    %171 = vector.broadcast %cst_28 : f32 to vector<8x128xf32>
    %172 = arith.select %170, %6, %171 : vector<8x128xi1>, vector<8x128xf32>
    %cst_29 = arith.constant dense<0.000000e+00> : vector<128xf32>
    %173 = vector.multi_reduction <add>, %172, %cst_29 [0] : vector<8x128xf32> to vector<128xf32>
    %174 = vector.shape_cast %173 : vector<128xf32> to vector<1x128xf32>
    %175 = arith.addf %152, %174 : vector<1x128xf32>
    %176 = arith.mulf %174, %174 : vector<1x128xf32>
    %177 = arith.addf %154, %176 : vector<1x128xf32>
    %cst_30 = arith.constant 4.000000e+00 : f32
    %178 = vector.broadcast %cst_30 : f32 to vector<1x128xf32>
    %179 = arith.divf %175, %178 : vector<1x128xf32>
    %180 = arith.mulf %175, %179 : vector<1x128xf32>
    %181 = arith.subf %177, %180 : vector<1x128xf32>
    %cst_31 = arith.constant 1.000000e+00 : f32
    %182 = vector.broadcast %cst_31 : f32 to vector<1x128xf32>
    %183 = arith.subf %182, %181 : vector<1x128xf32>
    %cst_32 = arith.constant 4.000000e+00 : f32
    %184 = vector.broadcast %cst_32 : f32 to vector<1x128xf32>
    %185 = arith.divf %183, %184 : vector<1x128xf32>
    %cst_33 = arith.constant 0.000000e+00 : f32
    %186 = vector.broadcast %cst_33 : f32 to vector<1x128xf32>
    %187 = arith.maximumf %185, %186 : vector<1x128xf32>
    %188 = math.sqrt %187 : vector<1x128xf32>
    %189 = arith.subf %179, %188 : vector<1x128xf32>
    %190 = arith.cmpf ole, %189, %174 : vector<1x128xf32>
    %191 = arith.select %190, %189, %168 : vector<1x128xi1>, vector<1x128xf32>
    %c4_i32_34 = arith.constant 4 : i32
    %192 = vector.broadcast %c4_i32_34 : i32 to vector<8x128xi32>
    %193 = arith.cmpi eq, %96, %192 : vector<8x128xi32>
    %cst_35 = arith.constant 0.000000e+00 : f32
    %194 = vector.broadcast %cst_35 : f32 to vector<8x128xf32>
    %195 = arith.select %193, %6, %194 : vector<8x128xi1>, vector<8x128xf32>
    %cst_36 = arith.constant dense<0.000000e+00> : vector<128xf32>
    %196 = vector.multi_reduction <add>, %195, %cst_36 [0] : vector<8x128xf32> to vector<128xf32>
    %197 = vector.shape_cast %196 : vector<128xf32> to vector<1x128xf32>
    %198 = arith.addf %175, %197 : vector<1x128xf32>
    %199 = arith.mulf %197, %197 : vector<1x128xf32>
    %200 = arith.addf %177, %199 : vector<1x128xf32>
    %cst_37 = arith.constant 5.000000e+00 : f32
    %201 = vector.broadcast %cst_37 : f32 to vector<1x128xf32>
    %202 = arith.divf %198, %201 : vector<1x128xf32>
    %203 = arith.mulf %198, %202 : vector<1x128xf32>
    %204 = arith.subf %200, %203 : vector<1x128xf32>
    %cst_38 = arith.constant 1.000000e+00 : f32
    %205 = vector.broadcast %cst_38 : f32 to vector<1x128xf32>
    %206 = arith.subf %205, %204 : vector<1x128xf32>
    %cst_39 = arith.constant 5.000000e+00 : f32
    %207 = vector.broadcast %cst_39 : f32 to vector<1x128xf32>
    %208 = arith.divf %206, %207 : vector<1x128xf32>
    %cst_40 = arith.constant 0.000000e+00 : f32
    %209 = vector.broadcast %cst_40 : f32 to vector<1x128xf32>
    %210 = arith.maximumf %208, %209 : vector<1x128xf32>
    %211 = math.sqrt %210 : vector<1x128xf32>
    %212 = arith.subf %202, %211 : vector<1x128xf32>
    %213 = arith.cmpf ole, %212, %197 : vector<1x128xf32>
    %214 = arith.select %213, %212, %191 : vector<1x128xi1>, vector<1x128xf32>
    %c5_i32_41 = arith.constant 5 : i32
    %215 = vector.broadcast %c5_i32_41 : i32 to vector<8x128xi32>
    %216 = arith.cmpi eq, %96, %215 : vector<8x128xi32>
    %cst_42 = arith.constant 0.000000e+00 : f32
    %217 = vector.broadcast %cst_42 : f32 to vector<8x128xf32>
    %218 = arith.select %216, %6, %217 : vector<8x128xi1>, vector<8x128xf32>
    %cst_43 = arith.constant dense<0.000000e+00> : vector<128xf32>
    %219 = vector.multi_reduction <add>, %218, %cst_43 [0] : vector<8x128xf32> to vector<128xf32>
    %220 = vector.shape_cast %219 : vector<128xf32> to vector<1x128xf32>
    %221 = arith.addf %198, %220 : vector<1x128xf32>
    %222 = arith.mulf %220, %220 : vector<1x128xf32>
    %223 = arith.addf %200, %222 : vector<1x128xf32>
    %cst_44 = arith.constant 6.000000e+00 : f32
    %224 = vector.broadcast %cst_44 : f32 to vector<1x128xf32>
    %225 = arith.divf %221, %224 : vector<1x128xf32>
    %226 = arith.mulf %221, %225 : vector<1x128xf32>
    %227 = arith.subf %223, %226 : vector<1x128xf32>
    %cst_45 = arith.constant 1.000000e+00 : f32
    %228 = vector.broadcast %cst_45 : f32 to vector<1x128xf32>
    %229 = arith.subf %228, %227 : vector<1x128xf32>
    %cst_46 = arith.constant 6.000000e+00 : f32
    %230 = vector.broadcast %cst_46 : f32 to vector<1x128xf32>
    %231 = arith.divf %229, %230 : vector<1x128xf32>
    %cst_47 = arith.constant 0.000000e+00 : f32
    %232 = vector.broadcast %cst_47 : f32 to vector<1x128xf32>
    %233 = arith.maximumf %231, %232 : vector<1x128xf32>
    %234 = math.sqrt %233 : vector<1x128xf32>
    %235 = arith.subf %225, %234 : vector<1x128xf32>
    %236 = arith.cmpf ole, %235, %220 : vector<1x128xf32>
    %237 = arith.select %236, %235, %214 : vector<1x128xi1>, vector<1x128xf32>
    %c6_i32_48 = arith.constant 6 : i32
    %238 = vector.broadcast %c6_i32_48 : i32 to vector<8x128xi32>
    %239 = arith.cmpi eq, %96, %238 : vector<8x128xi32>
    %cst_49 = arith.constant 0.000000e+00 : f32
    %240 = vector.broadcast %cst_49 : f32 to vector<8x128xf32>
    %241 = arith.select %239, %6, %240 : vector<8x128xi1>, vector<8x128xf32>
    %cst_50 = arith.constant dense<0.000000e+00> : vector<128xf32>
    %242 = vector.multi_reduction <add>, %241, %cst_50 [0] : vector<8x128xf32> to vector<128xf32>
    %243 = vector.shape_cast %242 : vector<128xf32> to vector<1x128xf32>
    %244 = arith.addf %221, %243 : vector<1x128xf32>
    %245 = arith.mulf %243, %243 : vector<1x128xf32>
    %246 = arith.addf %223, %245 : vector<1x128xf32>
    %cst_51 = arith.constant 7.000000e+00 : f32
    %247 = vector.broadcast %cst_51 : f32 to vector<1x128xf32>
    %248 = arith.divf %244, %247 : vector<1x128xf32>
    %249 = arith.mulf %244, %248 : vector<1x128xf32>
    %250 = arith.subf %246, %249 : vector<1x128xf32>
    %cst_52 = arith.constant 1.000000e+00 : f32
    %251 = vector.broadcast %cst_52 : f32 to vector<1x128xf32>
    %252 = arith.subf %251, %250 : vector<1x128xf32>
    %cst_53 = arith.constant 7.000000e+00 : f32
    %253 = vector.broadcast %cst_53 : f32 to vector<1x128xf32>
    %254 = arith.divf %252, %253 : vector<1x128xf32>
    %cst_54 = arith.constant 0.000000e+00 : f32
    %255 = vector.broadcast %cst_54 : f32 to vector<1x128xf32>
    %256 = arith.maximumf %254, %255 : vector<1x128xf32>
    %257 = math.sqrt %256 : vector<1x128xf32>
    %258 = arith.subf %248, %257 : vector<1x128xf32>
    %259 = arith.cmpf ole, %258, %243 : vector<1x128xf32>
    %260 = arith.select %259, %258, %237 : vector<1x128xi1>, vector<1x128xf32>
    %c7_i32_55 = arith.constant 7 : i32
    %261 = vector.broadcast %c7_i32_55 : i32 to vector<8x128xi32>
    %262 = arith.cmpi eq, %96, %261 : vector<8x128xi32>
    %cst_56 = arith.constant 0.000000e+00 : f32
    %263 = vector.broadcast %cst_56 : f32 to vector<8x128xf32>
    %264 = arith.select %262, %6, %263 : vector<8x128xi1>, vector<8x128xf32>
    %cst_57 = arith.constant dense<0.000000e+00> : vector<128xf32>
    %265 = vector.multi_reduction <add>, %264, %cst_57 [0] : vector<8x128xf32> to vector<128xf32>
    %266 = vector.shape_cast %265 : vector<128xf32> to vector<1x128xf32>
    %267 = arith.addf %244, %266 : vector<1x128xf32>
    %268 = arith.mulf %266, %266 : vector<1x128xf32>
    %269 = arith.addf %246, %268 : vector<1x128xf32>
    %cst_58 = arith.constant 8.000000e+00 : f32
    %270 = vector.broadcast %cst_58 : f32 to vector<1x128xf32>
    %271 = arith.divf %267, %270 : vector<1x128xf32>
    %272 = arith.mulf %267, %271 : vector<1x128xf32>
    %273 = arith.subf %269, %272 : vector<1x128xf32>
    %cst_59 = arith.constant 1.000000e+00 : f32
    %274 = vector.broadcast %cst_59 : f32 to vector<1x128xf32>
    %275 = arith.subf %274, %273 : vector<1x128xf32>
    %cst_60 = arith.constant 8.000000e+00 : f32
    %276 = vector.broadcast %cst_60 : f32 to vector<1x128xf32>
    %277 = arith.divf %275, %276 : vector<1x128xf32>
    %cst_61 = arith.constant 0.000000e+00 : f32
    %278 = vector.broadcast %cst_61 : f32 to vector<1x128xf32>
    %279 = arith.maximumf %277, %278 : vector<1x128xf32>
    %280 = math.sqrt %279 : vector<1x128xf32>
    %281 = arith.subf %271, %280 : vector<1x128xf32>
    %282 = arith.cmpf ole, %281, %266 : vector<1x128xf32>
    %283 = arith.select %282, %281, %260 : vector<1x128xi1>, vector<1x128xf32>
    %284 = vector.broadcast %283 : vector<1x128xf32> to vector<8x128xf32>
    %285 = arith.subf %6, %284 : vector<8x128xf32>
    %cst_62 = arith.constant 0.000000e+00 : f32
    %286 = vector.broadcast %cst_62 : f32 to vector<8x128xf32>
    %287 = arith.maximumf %285, %286 : vector<8x128xf32>
    %288 = arith.mulf %287, %287 : vector<8x128xf32>
    %289 = tpu.transpose %288, [1, 0] : vector<8x128xf32> -> vector<128x8xf32>
    %290 = vector.extract_strided_slice %289 {offsets = [0, 0], sizes = [128, 1], strides = [1, 1]} : vector<128x8xf32> to vector<128x1xf32>
    %c0_63 = arith.constant 0 : index
    %c0_64 = arith.constant 0 : index
    %291 = vector.load %arg2[%c0_63, %c0_64] : memref<128x256xf32, #tpu.memory_space<vmem>>, vector<128x32xf32>
    %292 = vector.broadcast %290 : vector<128x1xf32> to vector<128x32xf32>
    %293 = arith.mulf %292, %291 : vector<128x32xf32>
    %294 = vector.extract_strided_slice %289 {offsets = [0, 1], sizes = [128, 1], strides = [1, 1]} : vector<128x8xf32> to vector<128x1xf32>
    %c0_65 = arith.constant 0 : index
    %c32 = arith.constant 32 : index
    %295 = vector.load %arg2[%c0_65, %c32] : memref<128x256xf32, #tpu.memory_space<vmem>>, vector<128x32xf32>
    %296 = vector.broadcast %294 : vector<128x1xf32> to vector<128x32xf32>
    %297 = arith.mulf %296, %295 : vector<128x32xf32>
    %298 = arith.addf %293, %297 : vector<128x32xf32>
    %299 = vector.extract_strided_slice %289 {offsets = [0, 2], sizes = [128, 1], strides = [1, 1]} : vector<128x8xf32> to vector<128x1xf32>
    %c0_66 = arith.constant 0 : index
    %c64 = arith.constant 64 : index
    %300 = vector.load %arg2[%c0_66, %c64] : memref<128x256xf32, #tpu.memory_space<vmem>>, vector<128x32xf32>
    %301 = vector.broadcast %299 : vector<128x1xf32> to vector<128x32xf32>
    %302 = arith.mulf %301, %300 : vector<128x32xf32>
    %303 = arith.addf %298, %302 : vector<128x32xf32>
    %304 = vector.extract_strided_slice %289 {offsets = [0, 3], sizes = [128, 1], strides = [1, 1]} : vector<128x8xf32> to vector<128x1xf32>
    %c0_67 = arith.constant 0 : index
    %c96 = arith.constant 96 : index
    %305 = vector.load %arg2[%c0_67, %c96] : memref<128x256xf32, #tpu.memory_space<vmem>>, vector<128x32xf32>
    %306 = vector.broadcast %304 : vector<128x1xf32> to vector<128x32xf32>
    %307 = arith.mulf %306, %305 : vector<128x32xf32>
    %308 = arith.addf %303, %307 : vector<128x32xf32>
    %309 = vector.extract_strided_slice %289 {offsets = [0, 4], sizes = [128, 1], strides = [1, 1]} : vector<128x8xf32> to vector<128x1xf32>
    %c0_68 = arith.constant 0 : index
    %c128 = arith.constant 128 : index
    %310 = vector.load %arg2[%c0_68, %c128] : memref<128x256xf32, #tpu.memory_space<vmem>>, vector<128x32xf32>
    %311 = vector.broadcast %309 : vector<128x1xf32> to vector<128x32xf32>
    %312 = arith.mulf %311, %310 : vector<128x32xf32>
    %313 = arith.addf %308, %312 : vector<128x32xf32>
    %314 = vector.extract_strided_slice %289 {offsets = [0, 5], sizes = [128, 1], strides = [1, 1]} : vector<128x8xf32> to vector<128x1xf32>
    %c0_69 = arith.constant 0 : index
    %c160 = arith.constant 160 : index
    %315 = vector.load %arg2[%c0_69, %c160] : memref<128x256xf32, #tpu.memory_space<vmem>>, vector<128x32xf32>
    %316 = vector.broadcast %314 : vector<128x1xf32> to vector<128x32xf32>
    %317 = arith.mulf %316, %315 : vector<128x32xf32>
    %318 = arith.addf %313, %317 : vector<128x32xf32>
    %319 = vector.extract_strided_slice %289 {offsets = [0, 6], sizes = [128, 1], strides = [1, 1]} : vector<128x8xf32> to vector<128x1xf32>
    %c0_70 = arith.constant 0 : index
    %c192 = arith.constant 192 : index
    %320 = vector.load %arg2[%c0_70, %c192] : memref<128x256xf32, #tpu.memory_space<vmem>>, vector<128x32xf32>
    %321 = vector.broadcast %319 : vector<128x1xf32> to vector<128x32xf32>
    %322 = arith.mulf %321, %320 : vector<128x32xf32>
    %323 = arith.addf %318, %322 : vector<128x32xf32>
    %324 = vector.extract_strided_slice %289 {offsets = [0, 7], sizes = [128, 1], strides = [1, 1]} : vector<128x8xf32> to vector<128x1xf32>
    %c0_71 = arith.constant 0 : index
    %c224 = arith.constant 224 : index
    %325 = vector.load %arg2[%c0_71, %c224] : memref<128x256xf32, #tpu.memory_space<vmem>>, vector<128x32xf32>
    %326 = vector.broadcast %324 : vector<128x1xf32> to vector<128x32xf32>
    %327 = arith.mulf %326, %325 : vector<128x32xf32>
    %328 = arith.addf %323, %327 : vector<128x32xf32>
    %c0_72 = arith.constant 0 : index
    %c0_73 = arith.constant 0 : index
    %329 = vector.load %arg3[%c0_72, %c0_73] : memref<128x32xf32, #tpu.memory_space<vmem>>, vector<128x32xf32>
    tpu.vector_store %arg3[%c0_72, %c0_73], %328 {strides = array<i32>} : memref<128x32xf32, #tpu.memory_space<vmem>>, vector<128x32xf32>,
    return
  }
  func.func @transform_0(%arg0: i32) -> (i32, i32) {
    %c0_i32 = arith.constant 0 : i32
    %c0_i32_0 = arith.constant 0 : i32
    return %c0_i32, %arg0 : i32, i32
  }
  func.func @transform_1(%arg0: i32) -> (i32, i32) {
    %c0_i32 = arith.constant 0 : i32
    %c0_i32_0 = arith.constant 0 : i32
    return %arg0, %c0_i32 : i32, i32
  }
  func.func @transform_2(%arg0: i32) -> (i32, i32) {
    %c0_i32 = arith.constant 0 : i32
    %c0_i32_0 = arith.constant 0 : i32
    return %arg0, %c0_i32 : i32, i32
  }
}

</mosaic_0001>

<bundles_post_ra>
// kernel: tpu_custom_call.1
= control target key start
LH: loop header
LB: loop body
LE: loop exit
PB: predicated region body
PF: predicated region fallthrough
CT: control target
= control target key end

     0   :  { %7 = vsyncpa [#allocation3], 0  ;;  %s2919_s0 = inlined_call_operand.hbm [shape: f32[8,128], index: 0, kind: input, shape index: {}]   ;;  %s2920_s1 = inlined_call_operand.hbm [shape: f32[128,256], index: 1, kind: input, shape index: {}]   ;;  %s2921_s2 = inlined_call_operand.vmem [shape: f32[128,32], index: 2, kind: output, shape index: {}]  }
   0x1   :  { %8 = vsyncpa [#allocation5], 0  ;;  %s1784_s9 = smov [#allocation2]   ;;  %s1785_s11 = smov [#allocation4]  }
   0x2   :  { %s15_s10 = sshll.u32 %s1784_s9, 4  ;;  %s24_s12 = sshll.u32 %s1785_s11, 4  ;;  %s16_s10 = int_to_ptr.vmem [resolvable:$true] %s15_s10  ;;  %s1814_s12 = int_to_ptr.vmem [resolvable:$true] %s24_s12 }
   0x3   :  { %s1736_s15 = scalar_lea.hbm %s2919_s0, 128 }
   0x4   :  { %p1737_p0 = scmp.ne.s32.totalorder %s2919_s0, %s1736_s15  ;;  %p1740_p1 = scmp.lt.u32.totalorder %s1736_s15, %s2919_s0 }
   0x6   :  { %p1742_p2 = pnand %p1740_p1, %p1737_p0 }
   0x8   :  { %1745 = shalt.err (!%p1742_p2)
}
   0x9   :  { %s1746_s20 = scalar_lea.vmem %s16_s10, 128  ;;  %p1751_p4 = scmp.lt.s32.totalorder %s16_s10, %s16_s10 }
   0xa   :  { %p1747_p3 = scmp.ne.s32.totalorder %s16_s10, %s1746_s20  ;;  %p1752_p5 = scmp.lt.s32.totalorder %s1746_s20, %s1746_s20 }
   0xc   :  { %p1753_p6 = por %p1752_p5, %p1751_p4 }
   0xe   :  { %p1754_p7 = pnand %p1753_p6, %p1747_p3 }
  0x10   :  { %1757 = shalt.err (!%p1754_p7)
}
  0x11   :  { %18 = dma.hbm_to_vmem [thread:$0]  %s2919_s0, 128, %s16_s10, [#allocation3]  }
  0x12   :  { %s1758_s25 = scalar_lea.hbm %s2920_s1, 4096 }
  0x13   :  { %p1759_p8 = scmp.ne.s32.totalorder %s2920_s1, %s1758_s25  ;;  %p1762_p9 = scmp.lt.u32.totalorder %s1758_s25, %s2920_s1 }
  0x15   :  { %p1764_p10 = pnand %p1762_p9, %p1759_p8 }
  0x17   :  { %1767 = shalt.err (!%p1764_p10)
}
  0x18   :  { %s1768_s30 = scalar_lea.vmem %s1814_s12, 4096  ;;  %p1773_p12 = scmp.lt.s32.totalorder %s1814_s12, %s1814_s12 }
  0x19   :  { %p1769_p11 = scmp.ne.s32.totalorder %s1814_s12, %s1768_s30  ;;  %p1774_p13 = scmp.lt.s32.totalorder %s1768_s30, %s1768_s30 }
  0x1b   :  { %p1775_p0 = por %p1774_p13, %p1773_p12 }
  0x1d   :  { %p1776_p1 = pnand %p1775_p0, %p1769_p11 }
  0x1f   :  { %1779 = shalt.err (!%p1776_p1)
}
  0x20   :  { %s1786_s0 = smov 256   ;;  %s1787_s3 = smov 16  }
  0x21   :  { %30 = dma.hbm_to_vmem [thread:$0]  %s2920_s1, 4096, %s1814_s12, [#allocation5], %s1786_s0, %s1786_s0, %s1787_s3  }
  0x22   :  { %1780 = dma.done.wait [#allocation3], 128  }
  0x23   :  { %1781 = vsyncadd [#allocation3], 4294967168 }
  0x24   :  { %1782 = dma.done.wait [#allocation5], 4096  }
  0x25   :  { %1783 = vsyncadd [#allocation5], 4294963200  ;;  %v1788_v0 = vmov 1   ;;  %v37_v1 = vld [vmem:[#allocation2] sm:$0xff]  ;;  %v46_v5 = vlaneseq  ;;  %v2925_v24 = vmov 0   ;;  %s1794_s1 = smov 64  }
  0x26   :  { %1615 = vset.pattern.permute.xlu1 %v1788_v0  ;;  %v38_v2 = vrot.slane %v37_v1, 4  ;;  %s1795_s6 = smov 96   ;;  %s1796_s7 = smov 32  }
  0x27   :  { %v1846_v8 = vshrl.u32 %v46_v5, 7 }
  0x28   :  { %v39_v3 = vmax.f32 %v37_v1, %v38_v2 }
  0x29   :  { %v50_v11 = vsub.s32 0, %v1846_v8  ;;  %v60_v12 = vsub.s32 1, %v1846_v8  ;;  %v71_v13 = vsub.s32 2, %v1846_v8  ;;  %v82_v15 = vsub.s32 3, %v1846_v8 }
  0x2a   :  { %v40_v4 = vrot.slane %v39_v3, 2  ;;  %vm54_vm0 = vcmp.gt.s32.totalorder %v1846_v8, 0  ;;  %v93_v19 = vsub.s32 4, %v1846_v8  ;;  %vm64_vm1 = vcmp.gt.s32.totalorder %v1846_v8, 1 }
  0x2b   :  { %v104_v20 = vsub.s32 5, %v1846_v8  ;;  %vm75_vm9 = vcmp.gt.s32.totalorder %v1846_v8, 2  ;;  %v115_v23 = vsub.s32 6, %v1846_v8  ;;  %vm86_vm14 = vcmp.gt.s32.totalorder %v1846_v8, 3 }
  0x2c   :  { %v41_v6 = vmax.f32 %v39_v3, %v40_v4  ;;  %v126_v27 = vsub.s32 7, %v1846_v8 }
  0x2e   :  { %v42_v7 = vrot.slane %v41_v6, 1 }
  0x30   :  { %v43_v9 = vmax.f32 %v41_v6, %v42_v7 }
  0x32   :  { %v44_v10 = vsub.f32 %v37_v1, %v43_v9 }
  0x34   :  { %v1851_v14 = vmul.f32 0.5, %v44_v10 }
  0x36   :  { %v51_v16 = vrot.slane %v1851_v14, %v50_v11  ;;  %v61_v17 = vrot.slane %v1851_v14, %v60_v12  ;;  %v72_v18 = vrot.slane %v1851_v14, %v71_v13  ;;  %v83_v21 = vrot.slane %v1851_v14, %v82_v15 }
  0x37   :  { %v94_v22 = vrot.slane %v1851_v14, %v93_v19  ;;  %v105_v26 = vrot.slane %v1851_v14, %v104_v20  ;;  %v116_v30 = vrot.slane %v1851_v14, %v115_v23  ;;  %v127_v33 = vrot.slane %v1851_v14, %v126_v27 }
  0x38   :  { %vm52_vm2 = vcmp.gt.f32.partialorder %v51_v16, %v1851_v14  ;;  %vm53_vm3 = vcmp.eq.f32.partialorder %v51_v16, %v1851_v14  ;;  %vm63_vm4 = vcmp.eq.f32.partialorder %v61_v17, %v1851_v14  ;;  %vm62_vm6 = vcmp.gt.f32.partialorder %v61_v17, %v1851_v14 }
  0x39   :  { %vm55_vm5 = vmand %vm53_vm3, %vm54_vm0  ;;  %vm74_vm8 = vcmp.eq.f32.partialorder %v72_v18, %v1851_v14  ;;  %vm73_vm11 = vcmp.gt.f32.partialorder %v72_v18, %v1851_v14  ;;  %vm85_vm13 = vcmp.eq.f32.partialorder %v83_v21, %v1851_v14  ;;  %vm84_vm0 = vcmp.gt.f32.partialorder %v83_v21, %v1851_v14 }
  0x3a   :  { %vm56_vm7 = vmor %vm52_vm2, %vm55_vm5  ;;  %vm97_vm3 = vcmp.gt.s32.totalorder %v1846_v8, 4  ;;  %vm95_vm5 = vcmp.gt.f32.partialorder %v94_v22, %v1851_v14 }
  0x3b   :  { %v57_v25 = vsel %vm56_vm7, 1, %v2925_v24  ;;  %vm65_vm10 = vmand %vm63_vm4, %vm64_vm1  ;;  %vm96_vm1 = vcmp.eq.f32.partialorder %v94_v22, %v1851_v14  ;;  %vm107_vm7 = vcmp.eq.f32.partialorder %v105_v26, %v1851_v14 }
  0x3c   :  { %vm66_vm12 = vmor %vm62_vm6, %vm65_vm10  ;;  %vm106_vm10 = vcmp.gt.f32.partialorder %v105_v26, %v1851_v14 }
  0x3d   :  { %v67_v28 = vsel %vm66_vm12, 1, %v2925_v24  ;;  %vm76_vm15 = vmand %vm74_vm8, %vm75_vm9  ;;  %vm108_vm8 = vcmp.gt.s32.totalorder %v1846_v8, 5  ;;  %vm118_vm12 = vcmp.eq.f32.partialorder %v116_v30, %v1851_v14 }
  0x3e   :  { %v68_v29 = vadd.s32 %v67_v28, %v57_v25  ;;  %vm77_vm2 = vmor %vm73_vm11, %vm76_vm15  ;;  %vm117_vm15 = vcmp.gt.f32.partialorder %v116_v30, %v1851_v14 }
  0x3f   :  { %v78_v31 = vsel %vm77_vm2, 1, %v2925_v24  ;;  %vm87_vm4 = vmand %vm85_vm13, %vm86_vm14  ;;  %vm119_vm13 = vcmp.gt.s32.totalorder %v1846_v8, 6  ;;  %vm128_vm2 = vcmp.gt.f32.partialorder %v127_v33, %v1851_v14 }
  0x40   :  { %v79_v32 = vadd.s32 %v78_v31, %v68_v29  ;;  %vm88_vm6 = vmor %vm84_vm0, %vm87_vm4  ;;  %v133_v41 = vsel %vm128_vm2, 1, %v2925_v24 }
  0x41   :  { %v89_v34 = vsel %vm88_vm6, 1, %v2925_v24  ;;  %vm98_vm9 = vmand %vm96_vm1, %vm97_vm3 }
  0x42   :  { %v90_v35 = vadd.s32 %v89_v34, %v79_v32  ;;  %vm99_vm11 = vmor %vm95_vm5, %vm98_vm9 }
  0x43   :  { %v100_v36 = vsel %vm99_vm11, 1, %v2925_v24  ;;  %vm109_vm14 = vmand %vm107_vm7, %vm108_vm8 }
  0x44   :  { %v101_v37 = vadd.s32 %v100_v36, %v90_v35  ;;  %vm110_vm0 = vmor %vm106_vm10, %vm109_vm14 }
  0x45   :  { %v111_v38 = vsel %vm110_vm0, 1, %v2925_v24  ;;  %vm120_vm1 = vmand %vm118_vm12, %vm119_vm13 }
  0x46   :  { %v112_v39 = vadd.s32 %v111_v38, %v101_v37  ;;  %vm121_vm3 = vmor %vm117_vm15, %vm120_vm1 }
  0x47   :  { %v122_v40 = vsel %vm121_vm3, 1, %v2925_v24 }
  0x48   :  { %v123_v42 = vadd.s32 %v122_v40, %v112_v39 }
  0x4a   :  { %v134_v43 = vadd.s32 %v133_v41, %v123_v42 }
  0x4c   :  { %vm135_vm4 = vcmp.eq.s32.totalorder %v134_v43, 0  ;;  %vm160_vm5 = vcmp.eq.s32.totalorder %v134_v43, 1  ;;  %vm188_vm6 = vcmp.eq.s32.totalorder %v134_v43, 2  ;;  %vm216_vm7 = vcmp.eq.s32.totalorder %v134_v43, 3 }
  0x4d   :  { %v136_v44 = vsel %vm135_vm4, %v1851_v14, 0.0  ;;  %v161_v45 = vsel %vm160_vm5, %v1851_v14, 0.0  ;;  %v189_v46 = vsel %vm188_vm6, %v1851_v14, 0.0  ;;  %v217_v47 = vsel %vm216_vm7, %v1851_v14, 0.0 }
  0x4e   :  { %v137_v48 = vrot.slane %v136_v44, 4  ;;  %v162_v49 = vrot.slane %v161_v45, 4  ;;  %v190_v50 = vrot.slane %v189_v46, 4  ;;  %v218_v51 = vrot.slane %v217_v47, 4 }
  0x4f   :  { %vm244_vm8 = vcmp.eq.s32.totalorder %v134_v43, 4  ;;  %vm272_vm9 = vcmp.eq.s32.totalorder %v134_v43, 5  ;;  %vm300_vm10 = vcmp.eq.s32.totalorder %v134_v43, 6  ;;  %vm328_vm11 = vcmp.eq.s32.totalorder %v134_v43, 7 }
  0x50   :  { %v138_v52 = vadd.f32 %v137_v48, %v136_v44  ;;  %v163_v53 = vadd.f32 %v162_v49, %v161_v45  ;;  %v191_v54 = vadd.f32 %v190_v50, %v189_v46  ;;  %v219_v55 = vadd.f32 %v218_v51, %v217_v47 }
  0x51   :  { %v245_v56 = vsel %vm244_vm8, %v1851_v14, 0.0  ;;  %v273_v57 = vsel %vm272_vm9, %v1851_v14, 0.0  ;;  %v301_v58 = vsel %vm300_vm10, %v1851_v14, 0.0  ;;  %v329_v59 = vsel %vm328_vm11, %v1851_v14, 0.0 }
  0x52   :  { %v139_v60 = vrot.slane %v138_v52, 2  ;;  %v164_v61 = vrot.slane %v163_v53, 2  ;;  %v192_v62 = vrot.slane %v191_v54, 2  ;;  %v220_v63 = vrot.slane %v219_v55, 2 }
  0x53   :  { %v246_v1 = vrot.slane %v245_v56, 4  ;;  %v274_v2 = vrot.slane %v273_v57, 4  ;;  %v302_v3 = vrot.slane %v301_v58, 4  ;;  %v330_v4 = vrot.slane %v329_v59, 4 }
  0x54   :  { %v140_v5 = vadd.f32 %v139_v60, %v138_v52  ;;  %v165_v6 = vadd.f32 %v164_v61, %v163_v53  ;;  %v193_v7 = vadd.f32 %v192_v62, %v191_v54  ;;  %v221_v8 = vadd.f32 %v220_v63, %v219_v55 }
  0x55   :  { %v247_v9 = vadd.f32 %v246_v1, %v245_v56  ;;  %v275_v10 = vadd.f32 %v274_v2, %v273_v57  ;;  %v303_v11 = vadd.f32 %v302_v3, %v301_v58  ;;  %v331_v12 = vadd.f32 %v330_v4, %v329_v59 }
  0x56   :  { %v141_v13 = vrot.slane %v140_v5, 1  ;;  %v166_v15 = vrot.slane %v165_v6, 1  ;;  %v194_v16 = vrot.slane %v193_v7, 1  ;;  %v222_v17 = vrot.slane %v221_v8, 1 }
  0x57   :  { %v248_v18 = vrot.slane %v247_v9, 2  ;;  %v276_v19 = vrot.slane %v275_v10, 2  ;;  %v304_v20 = vrot.slane %v303_v11, 2  ;;  %v332_v21 = vrot.slane %v331_v12, 2 }
  0x58   :  { %v1906_v22 = vadd.f32 %v141_v13, %v140_v5  ;;  %v1908_v23 = vadd.f32 %v166_v15, %v165_v6  ;;  %v1910_v25 = vadd.f32 %v194_v16, %v193_v7  ;;  %v1912_v26 = vadd.f32 %v222_v17, %v221_v8 }
  0x59   :  { %v249_v27 = vadd.f32 %v248_v18, %v247_v9  ;;  %v277_v28 = vadd.f32 %v276_v19, %v275_v10  ;;  %v305_v29 = vadd.f32 %v304_v20, %v303_v11  ;;  %v333_v30 = vadd.f32 %v332_v21, %v331_v12 }
  0x5a   :  { %v144_v31 = vmul.f32 %v1906_v22, %v1906_v22  ;;  %v168_v32 = vadd.f32 %v1908_v23, %v1906_v22  ;;  %v169_v33 = vmul.f32 %v1908_v23, %v1908_v23  ;;  %v197_v34 = vmul.f32 %v1910_v25, %v1910_v25 }
  0x5b   :  { %v225_v35 = vmul.f32 %v1912_v26, %v1912_v26  ;;  %v250_v36 = vrot.slane %v249_v27, 1  ;;  %v278_v37 = vrot.slane %v277_v28, 1  ;;  %v306_v38 = vrot.slane %v305_v29, 1 }
  0x5c   :  { %v147_v39 = vsub.f32 %v144_v31, %v144_v31  ;;  %v170_v40 = vadd.f32 %v169_v33, %v144_v31  ;;  %v1924_v41 = vmul.f32 0.5, %v168_v32  ;;  %v196_v42 = vadd.f32 %v1910_v25, %v168_v32 }
  0x5d   :  { %v1927_v43 = vadd.f32 %v250_v36, %v249_v27  ;;  %v1929_v44 = vadd.f32 %v278_v37, %v277_v28  ;;  %v1937_v51 = vadd.f32 %v306_v38, %v305_v29  ;;  %v334_v52 = vrot.slane %v333_v30, 1 }
  0x5e   :  { %v148_v45 = vsub.f32 1.0, %v147_v39  ;;  %v173_v46 = vmul.f32 %v1924_v41, %v168_v32  ;;  %v198_v47 = vadd.f32 %v197_v34, %v170_v40  ;;  %v1932_v48 = vmul.f32 0.33333334, %v196_v42 }
  0x5f   :  { %v224_v49 = vadd.f32 %v1912_v26, %v196_v42  ;;  %v253_v50 = vmul.f32 %v1927_v43, %v1927_v43  ;;  %v281_v59 = vmul.f32 %v1929_v44, %v1929_v44  ;;  %v309_v60 = vmul.f32 %v1937_v51, %v1937_v51 }
  0x60   :  { %v149_v53 = vmax.f32 %v148_v45, 0.0  ;;  %v174_v54 = vsub.f32 %v170_v40, %v173_v46  ;;  %v201_v55 = vmul.f32 %v1932_v48, %v196_v42  ;;  %v226_v56 = vadd.f32 %v225_v35, %v198_v47 }
  0x61   :  { %v1940_v57 = vmul.f32 0.25, %v224_v49  ;;  %v252_v58 = vadd.f32 %v1927_v43, %v224_v49  ;;  %v1951_v4 = vadd.f32 %v334_v52, %v333_v30 }
  0x62   :  { %1710 = vrsqrt.f32 %v149_v53  ;;  %v175_v61 = vsub.f32 1.0, %v174_v54  ;;  %v202_v62 = vsub.f32 %v198_v47, %v201_v55  ;;  %v254_v1 = vadd.f32 %v253_v50, %v226_v56 }
  0x63   :  { %v229_v63 = vmul.f32 %v1940_v57, %v224_v49  ;;  %v1948_v2 = vmul.f32 0.2, %v252_v58  ;;  %v280_v3 = vadd.f32 %v1929_v44, %v252_v58  ;;  %v337_v12 = vmul.f32 %v1951_v4, %v1951_v4 }
  0x64   :  { %v176_v5 = vmul.f32 0.5, %v175_v61  ;;  %v203_v6 = vsub.f32 1.0, %v202_v62  ;;  %v282_v8 = vadd.f32 %v281_v59, %v254_v1  ;;  %vm152_vm12 = vcmp.eq.f32.partialorder %v149_v53, inf }
  0x65   :  { %v230_v7 = vsub.f32 %v226_v56, %v229_v63  ;;  %v257_v9 = vmul.f32 %v1948_v2, %v252_v58  ;;  %v1954_v10 = vmul.f32 0.16666667, %v280_v3  ;;  %v308_v11 = vadd.f32 %v1937_v51, %v280_v3 }
  0x66   :  { %v177_v13 = vmax.f32 %v176_v5, 0.0  ;;  %v204_v15 = vmul.f32 0.33333334, %v203_v6  ;;  %v310_v17 = vadd.f32 %v309_v60, %v282_v8  ;;  %vm154_vm13 = vcmp.eq.f32.partialorder %v149_v53, 0.0 }
  0x67   :  { %v231_v16 = vsub.f32 1.0, %v230_v7  ;;  %v258_v18 = vsub.f32 %v254_v1, %v257_v9  ;;  %v285_v19 = vmul.f32 %v1954_v10, %v280_v3  ;;  %v1960_v20 = vmul.f32 0.14285715, %v308_v11 }
  0x68   :  { %v336_v21 = vadd.f32 %v1951_v4, %v308_v11  ;;  %1712 = vrsqrt.f32 %v177_v13  ;;  %v205_v27 = vmax.f32 %v204_v15, 0.0  ;;  %v155_v34 = vand.u32 2147483648, %v149_v53 }
  0x69   :  { %v232_v28 = vmul.f32 0.25, %v231_v16  ;;  %v259_v29 = vsub.f32 1.0, %v258_v18  ;;  %v286_v30 = vsub.f32 %v282_v8, %v285_v19  ;;  %v313_v31 = vmul.f32 %v1960_v20, %v308_v11 }
  0x6a   :  { %v1964_v32 = vmul.f32 0.125, %v336_v21  ;;  %1714 = vrsqrt.f32 %v205_v27  ;;  %v338_v35 = vadd.f32 %v337_v12, %v310_v17  ;;  %vm180_vm14 = vcmp.eq.f32.partialorder %v177_v13, inf }
  0x6b   :  { %v233_v37 = vmax.f32 %v232_v28, 0.0  ;;  %v260_v38 = vmul.f32 0.2, %v259_v29  ;;  %v287_v39 = vsub.f32 1.0, %v286_v30  ;;  %v314_v40 = vsub.f32 %v310_v17, %v313_v31 }
  0x6c   :  { %v1711_v33 = vpop.eup %1710  ;;  %v341_v42 = vmul.f32 %v1964_v32, %v336_v21  ;;  %v183_v56 = vand.u32 2147483648, %v177_v13  ;;  %vm182_vm15 = vcmp.eq.f32.partialorder %v177_v13, 0.0  ;;  %vm208_vm2 = vcmp.eq.f32.partialorder %v205_v27, inf }
  0x6d   :  { %v151_v36 = vmul.f32 %v1711_v33, %v149_v53  ;;  %1716 = vrsqrt.f32 %v233_v37  ;;  %v261_v47 = vmax.f32 %v260_v38, 0.0  ;;  %v288_v49 = vmul.f32 0.16666667, %v287_v39 }
  0x6e   :  { %v315_v52 = vsub.f32 1.0, %v314_v40  ;;  %v342_v54 = vsub.f32 %v338_v35, %v341_v42  ;;  %v211_v63 = vand.u32 2147483648, %v205_v27  ;;  %vm210_vm1 = vcmp.eq.f32.partialorder %v205_v27, 0.0 }
  0x6f   :  { %v153_v45 = vsel %vm152_vm12, %v149_v53, %v151_v36  ;;  %1718 = vrsqrt.f32 %v261_v47  ;;  %v289_v58 = vmax.f32 %v288_v49, 0.0  ;;  %vm236_vm3 = vcmp.eq.f32.partialorder %v233_v37, inf }
  0x70   :  { %v156_v46 = vsel %vm154_vm13, %v155_v34, %v153_v45  ;;  %v316_v59 = vmul.f32 0.14285715, %v315_v52  ;;  %v343_v60 = vsub.f32 1.0, %v342_v54  ;;  %v239_v12 = vand.u32 2147483648, %v233_v37 }
  0x71   :  { %v157_v50 = vsub.f32 %v1906_v22, %v156_v46  ;;  %1720 = vrsqrt.f32 %v289_v58  ;;  %vm238_vm5 = vcmp.eq.f32.partialorder %v233_v37, 0.0  ;;  %vm264_vm6 = vcmp.eq.f32.partialorder %v261_v47, inf }
  0x72   :  { %v1713_v55 = vpop.eup %1712  ;;  %v317_v1 = vmax.f32 %v316_v59, 0.0  ;;  %v344_v3 = vmul.f32 0.125, %v343_v60  ;;  %v267_v21 = vand.u32 2147483648, %v261_v47  ;;  %vm266_vm8 = vcmp.eq.f32.partialorder %v261_v47, 0.0 }
  0x73   :  { %v179_v61 = vmul.f32 %v1713_v55, %v177_v13  ;;  %vm158_vm0 = vcmp.le.f32.partialorder %v157_v50, %v1906_v22  ;;  %vm292_vm9 = vcmp.eq.f32.partialorder %v289_v58, inf  ;;  %v295_v31 = vand.u32 2147483648, %v289_v58 }
  0x74   :  { %v1715_v53 = vpop.eup %1714  ;;  %v159_v7 = vsel %vm158_vm0, %v157_v50, 0.0  ;;  %1722 = vrsqrt.f32 %v317_v1  ;;  %v345_v15 = vmax.f32 %v344_v3, 0.0  ;;  %vm294_vm11 = vcmp.eq.f32.partialorder %v289_v58, 0.0 }
  0x75   :  { %v181_v62 = vsel %vm180_vm14, %v177_v13, %v179_v61  ;;  %v207_v6 = vmul.f32 %v1715_v53, %v205_v27  ;;  %vm320_vm12 = vcmp.eq.f32.partialorder %v317_v1, inf  ;;  %vm322_vm14 = vcmp.eq.f32.partialorder %v317_v1, 0.0 }
  0x76   :  { %v184_v5 = vsel %vm182_vm15, %v183_v56, %v181_v62  ;;  %1724 = vrsqrt.f32 %v345_v15  ;;  %vm348_vm15 = vcmp.eq.f32.partialorder %v345_v15, inf  ;;  %v351_v45 = vand.u32 2147483648, %v345_v15 }
  0x77   :  { %v185_v8 = vsub.f32 %v1924_v41, %v184_v5  ;;  %v1717_v9 = vpop.eup %1716  ;;  %v209_v11 = vsel %vm208_vm2, %v205_v27, %v207_v6  ;;  %vm350_vm2 = vcmp.eq.f32.partialorder %v345_v15, 0.0 }
  0x78   :  { %v212_v22 = vsel %vm210_vm1, %v211_v63, %v209_v11  ;;  %v235_v16 = vmul.f32 %v1717_v9, %v233_v37 }
  0x79   :  { %vm186_vm4 = vcmp.le.f32.partialorder %v185_v8, %v1908_v23  ;;  %v213_v17 = vsub.f32 %v1932_v48, %v212_v22  ;;  %v1719_v18 = vpop.eup %1718 }
  0x7a   :  { %v187_v13 = vsel %vm186_vm4, %v185_v8, %v159_v7  ;;  %v237_v19 = vsel %vm236_vm3, %v233_v37, %v235_v16  ;;  %v263_v27 = vmul.f32 %v1719_v18, %v261_v47  ;;  %v323_v37 = vand.u32 2147483648, %v317_v1 }
  0x7b   :  { %vm214_vm7 = vcmp.le.f32.partialorder %v213_v17, %v1910_v25  ;;  %v240_v41 = vsel %vm238_vm5, %v239_v12, %v237_v19  ;;  %v1721_v23 = vpop.eup %1720  ;;  %v2149_v19 = vld [vmem:[#allocation4] sm:$0xff]  ;;  %vm1575_vm4 = vcmask 261120  }
  0x7c   :  { %v215_v28 = vsel %vm214_vm7, %v213_v17, %v187_v13  ;;  %v241_v29 = vsub.f32 %v1940_v57, %v240_v41  ;;  %v265_v30 = vsel %vm264_vm6, %v261_v47, %v263_v27  ;;  %v291_v33 = vmul.f32 %v1721_v23, %v289_v58  ;;  %v2157_v27 = vld [vmem:[#allocation4 + $0x10] sm:$0xff] }
  0x7d   :  { %v268_v48 = vsel %vm266_vm8, %v267_v21, %v265_v30 }
  0x7e   :  { %vm242_vm10 = vcmp.le.f32.partialorder %v241_v29, %v1912_v26  ;;  %v269_v35 = vsub.f32 %v1948_v2, %v268_v48  ;;  %v1723_v36 = vpop.eup %1722  ;;  %v293_v25 = vsel %vm292_vm9, %v289_v58, %v291_v33 }
  0x7f   :  { %v243_v34 = vsel %vm242_vm10, %v241_v29, %v215_v28  ;;  %v296_v38 = vsel %vm294_vm11, %v295_v31, %v293_v25  ;;  %v319_v57 = vmul.f32 %v1723_v36, %v317_v1  ;;  %v2171_v31 = vld [vmem:[#allocation4 + $0x18] sm:$0xff] }
  0x80   :  { %vm270_vm13 = vcmp.le.f32.partialorder %v269_v35, %v1927_v43  ;;  %v297_v40 = vsub.f32 %v1954_v10, %v296_v38  ;;  %v1725_v42 = vpop.eup %1724  ;;  %2943 = vst [vmem:[#allocation13_spill] sm:$0xff] %v2171_v31 }
  0x81   :  { %v271_v39 = vsel %vm270_vm13, %v269_v35, %v243_v34  ;;  %v321_v26 = vsel %vm320_vm12, %v317_v1, %v319_v57  ;;  %v347_v2 = vmul.f32 %v1725_v42, %v345_v15  ;;  %v2178_v35 = vld [vmem:[#allocation4 + $0x20] sm:$0xff] }
  0x82   :  { %vm298_vm0 = vcmp.le.f32.partialorder %v297_v40, %v1929_v44  ;;  %v324_v46 = vsel %vm322_vm14, %v323_v37, %v321_v26 }
  0x83   :  { %v299_v47 = vsel %vm298_vm0, %v297_v40, %v271_v39  ;;  %v325_v49 = vsub.f32 %v1960_v20, %v324_v46  ;;  %v349_v50 = vsel %vm348_vm15, %v345_v15, %v347_v2  ;;  %v1791_v20 = vmov 3  }
  0x84   :  { %v352_v43 = vsel %vm350_vm2, %v351_v45, %v349_v50  ;;  %v2205_v45 = vld [vmem:[#allocation4 + $0x30] sm:$0xff] }
  0x85   :  { %vm326_vm1 = vcmp.le.f32.partialorder %v325_v49, %v1937_v51  ;;  %v353_v54 = vsub.f32 %v1964_v32, %v352_v43  ;;  %v2924_v51 = vmov 2   ;;  %v2214_v43 = vld [vmem:[#allocation4 + $0x38] sm:$0xff] }
  0x86   :  { %v327_v52 = vsel %vm326_vm1, %v325_v49, %v299_v47  ;;  %2947 = vst [vmem:[#allocation17_spill] sm:$0xff] %v2214_v43 }
  0x87   :  { %vm354_vm3 = vcmp.le.f32.partialorder %v353_v54, %v1951_v4  ;;  %v2922_v4 = vmov 5  }
  0x88   :  { %v355_v10 = vsel %vm354_vm3, %v353_v54, %v327_v52  ;;  %v2218_v52 = vld [vmem:[#allocation4 + $0x40] sm:$0xff] }
  0x89   :  { %v356_v55 = vsub.f32 %v1851_v14, %v355_v10  ;;  %v2923_v14 = vmov 4   ;;  %2948 = vst [vmem:[#allocation18_spill] sm:$0xff] %v2218_v52 }
  0x8b   :  { %v357_v56 = vmax.f32 %v356_v55, 0.0 }
  0x8d   :  { %v358_v44 = vmul.f32 %v357_v56, %v357_v56 }
  0x8f   :  { %359 = vxpose.xlu0.b32.start.end [1/1] (short) %v358_v44, 128 }
  0xb8   :  { %1614 = vset.pattern.permute.xlu0 %v2925_v24 }
 0x10f   :  { %v1985_v58 = vpop.trf.xlu0 }
 0x110   :  { %504 = vperm.xlu1 %1615, %v1985_v58   ;;  %409 = vperm.xlu0 %1614, %v1985_v58  }
 0x113   :  { %v1997_v32 = vpop.trf.xlu0 }
 0x114   :  { %1616 = vset.pattern.permute.xlu1 %v2924_v51  ;;  %1617 = vset.pattern.permute.xlu0 %v1791_v20 }
 0x115   :  { %664 = vperm.xlu1 %1616, %v1985_v58   ;;  %824 = vperm.xlu0 %1617, %v1985_v58  }
 0x117   :  { %v2003_v59 = vpop.trf.xlu0 }
 0x119   :  { %1618 = vset.pattern.permute.xlu1 %v2923_v14  ;;  %1619 = vset.pattern.permute.xlu0 %v2922_v4 }
 0x11a   :  { %1000 = vperm.xlu1 %1618, %v1985_v58   ;;  %1096 = vperm.xlu0 %1619, %v1985_v58  }
 0x11b   :  { %v2009_v60 = vpop.trf.xlu0 }
 0x11e   :  { %1620 = vset.pattern.permute.xlu1 %v2925_v24  ;;  %1622 = vset.pattern.permute.xlu0 %v2924_v51 }
 0x11f   :  { %668 = vperm.xlu0 %1622, %v1997_v32   ;;  %414 = vperm.xlu1 %1620, %v1997_v32   ;;  %v2019_v61 = vpop.trf.xlu0 }
 0x123   :  { %1624 = vset.pattern.permute.xlu0 %v2923_v14  ;;  %1621 = vset.pattern.permute.xlu1 %v1788_v0  ;;  %v2029_v53 = vpop.trf.xlu0 }
 0x124   :  { %1004 = vperm.xlu0 %1624, %v1997_v32   ;;  %508 = vperm.xlu1 %1621, %v1997_v32  }
 0x127   :  { %v2039_v62 = vpop.trf.xlu0 }
 0x128   :  { %1635 = vset.pattern.permute.xlu0 %v1791_v20  ;;  %1623 = vset.pattern.permute.xlu1 %v1791_v20 }
 0x129   :  { %828 = vperm.xlu1 %1623, %v1997_v32   ;;  %836 = vperm.xlu0 %1635, %v2009_v60  }
 0x12b   :  { %v2049_v63 = vpop.trf.xlu0 }
 0x12d   :  { %1625 = vset.pattern.permute.xlu1 %v2922_v4  ;;  %1637 = vset.pattern.permute.xlu0 %v2922_v4 }
 0x12e   :  { %1100 = vperm.xlu1 %1625, %v1997_v32   ;;  %1108 = vperm.xlu0 %1637, %v2009_v60  }
 0x12f   :  { %v2059_v1 = vpop.trf.xlu0 }
 0x132   :  { %1626 = vset.pattern.permute.xlu1 %v2925_v24  ;;  %1640 = vset.pattern.permute.xlu0 %v2924_v51 }
 0x133   :  { %419 = vperm.xlu1 %1626, %v2003_v59   ;;  %680 = vperm.xlu0 %1640, %v2019_v61   ;;  %v2069_v3 = vpop.trf.xlu0 }
 0x137   :  { %1627 = vset.pattern.permute.xlu1 %v1788_v0  ;;  %1642 = vset.pattern.permute.xlu0 %v2923_v14  ;;  %v2079_v5 = vpop.trf.xlu0 }
 0x138   :  { %512 = vperm.xlu1 %1627, %v2003_v59   ;;  %1016 = vperm.xlu0 %1642, %v2019_v61  }
 0x13b   :  { %v2089_v6 = vpop.trf.xlu0 }
 0x13c   :  { %1628 = vset.pattern.permute.xlu1 %v2924_v51  ;;  %1647 = vset.pattern.permute.xlu0 %v1791_v20 }
 0x13d   :  { %672 = vperm.xlu1 %1628, %v2003_v59   ;;  %844 = vperm.xlu0 %1647, %v2029_v53  }
 0x13f   :  { %v2095_v7 = vpop.trf.xlu0 }
 0x141   :  { %1629 = vset.pattern.permute.xlu1 %v1791_v20  ;;  %1649 = vset.pattern.permute.xlu0 %v2922_v4 }
 0x142   :  { %832 = vperm.xlu1 %1629, %v2003_v59   ;;  %1116 = vperm.xlu0 %1649, %v2029_v53  }
 0x143   :  { %v2109_v8 = vpop.trf.xlu0 }
 0x146   :  { %1630 = vset.pattern.permute.xlu1 %v2923_v14  ;;  %1652 = vset.pattern.permute.xlu0 %v2924_v51 }
 0x147   :  { %1008 = vperm.xlu1 %1630, %v2003_v59   ;;  %688 = vperm.xlu0 %1652, %v2039_v62   ;;  %v2117_v11 = vpop.trf.xlu0 }
 0x148   :  { %2938 = vst [vmem:[#allocation8_spill] sm:$0xff] %v2117_v11 }
 0x14b   :  { %1631 = vset.pattern.permute.xlu1 %v2922_v4  ;;  %1654 = vset.pattern.permute.xlu0 %v2923_v14  ;;  %v2129_v22 = vpop.trf.xlu0 }
 0x14c   :  { %1104 = vperm.xlu1 %1631, %v2003_v59   ;;  %1024 = vperm.xlu0 %1654, %v2039_v62  }
 0x150   :  { %1632 = vset.pattern.permute.xlu1 %v2925_v24  ;;  %1659 = vset.pattern.permute.xlu0 %v1791_v20 }
 0x151   :  { %424 = vperm.xlu1 %1632, %v2009_v60   ;;  %852 = vperm.xlu0 %1659, %v2049_v63  }
 0x155   :  { %1633 = vset.pattern.permute.xlu1 %v1788_v0  ;;  %1661 = vset.pattern.permute.xlu0 %v2922_v4 }
 0x156   :  { %516 = vperm.xlu1 %1633, %v2009_v60   ;;  %1124 = vperm.xlu0 %1661, %v2049_v63  }
 0x15a   :  { %1634 = vset.pattern.permute.xlu1 %v2924_v51  ;;  %1664 = vset.pattern.permute.xlu0 %v2924_v51 }
 0x15b   :  { %676 = vperm.xlu1 %1634, %v2009_v60   ;;  %696 = vperm.xlu0 %1664, %v2059_v1  }
 0x15f   :  { %1636 = vset.pattern.permute.xlu1 %v2923_v14  ;;  %1666 = vset.pattern.permute.xlu0 %v2923_v14 }
 0x160   :  { %1012 = vperm.xlu1 %1636, %v2009_v60   ;;  %1032 = vperm.xlu0 %1666, %v2059_v1  }
 0x164   :  { %1638 = vset.pattern.permute.xlu1 %v2925_v24  ;;  %1671 = vset.pattern.permute.xlu0 %v1791_v20 }
 0x165   :  { %429 = vperm.xlu1 %1638, %v2019_v61   ;;  %860 = vperm.xlu0 %1671, %v2069_v3  }
 0x169   :  { %1639 = vset.pattern.permute.xlu1 %v1788_v0  ;;  %1673 = vset.pattern.permute.xlu0 %v2922_v4 }
 0x16a   :  { %520 = vperm.xlu1 %1639, %v2019_v61   ;;  %1132 = vperm.xlu0 %1673, %v2069_v3  }
 0x16e   :  { %1641 = vset.pattern.permute.xlu1 %v1791_v20  ;;  %1676 = vset.pattern.permute.xlu0 %v2924_v51 }
 0x16f   :  { %840 = vperm.xlu1 %1641, %v2019_v61   ;;  %704 = vperm.xlu0 %1676, %v2079_v5  }
 0x173   :  { %1643 = vset.pattern.permute.xlu1 %v2922_v4  ;;  %1678 = vset.pattern.permute.xlu0 %v2923_v14 }
 0x174   :  { %1112 = vperm.xlu1 %1643, %v2019_v61   ;;  %1040 = vperm.xlu0 %1678, %v2079_v5  }
 0x178   :  { %1644 = vset.pattern.permute.xlu1 %v2925_v24  ;;  %1682 = vset.pattern.permute.xlu0 %v1791_v20 }
 0x179   :  { %434 = vperm.xlu1 %1644, %v2029_v53   ;;  %868 = vperm.xlu0 %1682, %v2089_v6  }
 0x17d   :  { %1645 = vset.pattern.permute.xlu1 %v1788_v0  ;;  %1685 = vset.pattern.permute.xlu0 %v1788_v0 }
 0x17e   :  { %524 = vperm.xlu1 %1645, %v2029_v53   ;;  %552 = vperm.xlu0 %1685, %v2095_v7  }
 0x182   :  { %1646 = vset.pattern.permute.xlu1 %v2924_v51  ;;  %1686 = vset.pattern.permute.xlu0 %v2924_v51 }
 0x183   :  { %684 = vperm.xlu1 %1646, %v2029_v53   ;;  %712 = vperm.xlu0 %1686, %v2095_v7  }
 0x187   :  { %1648 = vset.pattern.permute.xlu1 %v2923_v14  ;;  %1688 = vset.pattern.permute.xlu0 %v2923_v14 }
 0x188   :  { %1020 = vperm.xlu1 %1648, %v2029_v53   ;;  %1048 = vperm.xlu0 %1688, %v2095_v7  }
 0x18c   :  { %1650 = vset.pattern.permute.xlu1 %v2925_v24  ;;  %1692 = vset.pattern.permute.xlu0 %v1791_v20 }
 0x18d   :  { %439 = vperm.xlu1 %1650, %v2039_v62   ;;  %876 = vperm.xlu0 %1692, %v2109_v8  }
 0x18f   :  { %v2115_v9 = vpop.permute.xlu1 %504  ;;  %v2163_v29 = vpop.permute.xlu0 %409 }
 0x190   :  { %2942 = vst [vmem:[#allocation12_spill] sm:$0xff] %v2163_v29 }
 0x191   :  { %1651 = vset.pattern.permute.xlu1 %v1788_v0  ;;  %1696 = vset.pattern.permute.xlu0 %v2924_v51 }
 0x192   :  { %528 = vperm.xlu1 %1651, %v2039_v62   ;;  %720 = vperm.xlu0 %1696, %v2117_v11  }
 0x194   :  { %v665_v12 = vpop.permute.xlu1 %664  ;;  %v2174_v34 = vpop.permute.xlu0 %824 }
 0x195   :  { %v727_v21 = vmul.f32 %v665_v12, %v2149_v19 }
 0x196   :  { %1653 = vset.pattern.permute.xlu1 %v1791_v20  ;;  %1698 = vset.pattern.permute.xlu0 %v2923_v14 }
 0x197   :  { %848 = vperm.xlu1 %1653, %v2039_v62   ;;  %1056 = vperm.xlu0 %1698, %v2117_v11  }
 0x199   :  { %v2127_v15 = vpop.permute.xlu1 %1000  ;;  %v2185_v37 = vpop.permute.xlu0 %1096 }
 0x19a   :  { %2939 = vst [vmem:[#allocation9_spill] sm:$0xff] %v2127_v15 }
 0x19b   :  { %1655 = vset.pattern.permute.xlu1 %v2922_v4  ;;  %1700 = vset.pattern.permute.xlu0 %v1788_v0 }
 0x19c   :  { %1120 = vperm.xlu1 %1655, %v2039_v62   ;;  %564 = vperm.xlu0 %1700, %v2129_v22  }
 0x19e   :  { %v2135_v16 = vpop.permute.xlu1 %414  ;;  %v2192_v57 = vpop.permute.xlu0 %668 }
 0x19f   :  { %2940 = vst [vmem:[#allocation10_spill] sm:$0xff] %v2135_v16  ;;  %v2347_v16 = vld [vmem:[#allocation4 + $0x90] sm:$0xff] }
 0x1a0   :  { %1656 = vset.pattern.permute.xlu1 %v2925_v24  ;;  %1702 = vset.pattern.permute.xlu0 %v1791_v20 }
 0x1a1   :  { %444 = vperm.xlu1 %1656, %v2049_v63   ;;  %884 = vperm.xlu0 %1702, %v2129_v22  }
 0x1a3   :  { %v509_v13 = vpop.permute.xlu1 %508  ;;  %v2199_v40 = vpop.permute.xlu0 %1004 }
 0x1a4   :  { %v568_v28 = vmul.f32 %v509_v13, %v2157_v27  ;;  %2945 = vst [vmem:[#allocation15_spill] sm:$0xff] %v2199_v40  ;;  %v2962_v40 = vmov 2  }
 0x1a5   :  { %1657 = vset.pattern.permute.xlu1 %v1788_v0  ;;  %1705 = vset.pattern.permute.xlu0 %v2922_v4 }
 0x1a6   :  { %532 = vperm.xlu1 %1657, %v2049_v63   ;;  %1140 = vperm.xlu0 %1705, %v2089_v6  }
 0x1a8   :  { %v829_v17 = vpop.permute.xlu1 %828  ;;  %v837_v26 = vpop.permute.xlu0 %836 }
 0x1a9   :  { %v888_v30 = vmul.f32 %v829_v17, %v2157_v27  ;;  %v890_v49 = vmul.f32 %v837_v26, %v2205_v45 }
 0x1aa   :  { %1658 = vset.pattern.permute.xlu1 %v2924_v51  ;;  %1148 = vperm.xlu0 %1705, %v2109_v8  }
 0x1ab   :  { %692 = vperm.xlu1 %1658, %v2049_v63  }
 0x1ad   :  { %v1101_v18 = vpop.permute.xlu1 %1100  ;;  %v1109_v47 = vpop.permute.xlu0 %1108 }
 0x1ae   :  { %1156 = vperm.xlu0 %1705, %v2129_v22   ;;  %v1160_v48 = vmul.f32 %v1101_v18, %v2171_v31  ;;  %v1162_v54 = vmul.f32 %v1109_v47, %v2214_v43  ;;  %v2264_v47 = vld [vmem:[#allocation4 + $0x60] sm:$0xff] }
 0x1af   :  { %1660 = vset.pattern.permute.xlu1 %v2923_v14 }
 0x1b0   :  { %1028 = vperm.xlu1 %1660, %v2049_v63  }
 0x1b2   :  { %v2154_v41 = vpop.permute.xlu1 %419  ;;  %759 = vrot.lane.b32.xlu0 %v727_v21, %s1794_s1  ;;  %v681_v10 = vpop.permute.xlu0 %680 }
 0x1b3   :  { %2941 = vst [vmem:[#allocation11_spill] sm:$0xff] %v2154_v41  ;;  %v731_v56 = vmul.f32 %v681_v10, %v2218_v52 }
 0x1b4   :  { %1662 = vset.pattern.permute.xlu1 %v2925_v24 }
 0x1b5   :  { %449 = vperm.xlu1 %1662, %v2059_v1  }
 0x1b6   :  { %601 = vrot.lane.b32.xlu0 %v568_v28, %s1795_s6 }
 0x1b7   :  { %v2165_v23 = vpop.permute.xlu1 %512  ;;  %v2243_v18 = vpop.permute.xlu0 %1016 }
 0x1b8   :  { %2951 = vst [vmem:[#allocation21_spill] sm:$0xff] %v2243_v18 }
 0x1b9   :  { %1663 = vset.pattern.permute.xlu1 %v1788_v0 }
 0x1ba   :  { %536 = vperm.xlu1 %1663, %v2059_v1   ;;  %921 = vrot.lane.b32.xlu0 %v888_v30, %s1796_s7  ;;  %v2251_v30 = vld [vmem:[#allocation4 + $0x50] sm:$0xff] }
 0x1bc   :  { %v673_v33 = vpop.permute.xlu1 %672  ;;  %v845_v28 = vpop.permute.xlu0 %844 }
 0x1bd   :  { %v729_v36 = vmul.f32 %v673_v33, %v2178_v35  ;;  %v892_v26 = vmul.f32 %v845_v28, %v2251_v30 }
 0x1be   :  { %1665 = vset.pattern.permute.xlu1 %v1791_v20  ;;  %1193 = vrot.lane.b32.xlu0 %v1160_v48, %s1795_s6 }
 0x1bf   :  { %856 = vperm.xlu1 %1665, %v2059_v1  }
 0x1c1   :  { %v2182_v25 = vpop.permute.xlu1 %832 }
 0x1c2   :  { %763 = vrot.lane.b32.xlu0 %v729_v36, %s1794_s1  ;;  %v1117_v36 = vpop.permute.xlu0 %1116 }
 0x1c3   :  { %1667 = vset.pattern.permute.xlu1 %v2922_v4 }
 0x1c4   :  { %1128 = vperm.xlu1 %1667, %v2059_v1  }
 0x1c6   :  { %v2189_v38 = vpop.permute.xlu1 %1008 }
 0x1c7   :  { %2944 = vst [vmem:[#allocation14_spill] sm:$0xff] %v2189_v38 }
 0x1c8   :  { %1668 = vset.pattern.permute.xlu1 %v2925_v24 }
 0x1c9   :  { %454 = vperm.xlu1 %1668, %v2069_v3  }
 0x1cb   :  { %v2195_v39 = vpop.permute.xlu1 %1104 }
 0x1cd   :  { %1669 = vset.pattern.permute.xlu1 %v1788_v0 }
 0x1ce   :  { %540 = vperm.xlu1 %1669, %v2069_v3  }
 0x1d0   :  { %v2201_v42 = vpop.permute.xlu1 %424 }
 0x1d1   :  { %2946 = vst [vmem:[#allocation16_spill] sm:$0xff] %v2201_v42  ;;  %v2344_v42 = vld [vmem:[#allocation4 + $0x8] sm:$0xff] }
 0x1d2   :  { %1670 = vset.pattern.permute.xlu1 %v2924_v51  ;;  %v1159_v15 = vmul.f32 %v2185_v37, %v2344_v42  ;;  %v2365_v37 = vld [vmem:[#allocation4 + $0xa0] sm:$0xff] }
 0x1d3   :  { %700 = vperm.xlu1 %1670, %v2069_v3  }
 0x1d5   :  { %v517_v46 = vpop.permute.xlu1 %516 }
 0x1d6   :  { %v570_v2 = vmul.f32 %v517_v46, %v2205_v45 }
 0x1d7   :  { %1672 = vset.pattern.permute.xlu1 %v2923_v14 }
 0x1d8   :  { %1036 = vperm.xlu1 %1672, %v2069_v3   ;;  %605 = vrot.lane.b32.xlu0 %v570_v2, %s1795_s6  ;;  %v2260_v2 = vld [vmem:[#allocation4 + $0x58] sm:$0xff] }
 0x1d9   :  { %2953 = vst [vmem:[#allocation23_spill] sm:$0xff] %v2260_v2 }
 0x1da   :  { %v2212_v50 = vpop.permute.xlu1 %676 }
 0x1dc   :  { %1674 = vset.pattern.permute.xlu1 %v2925_v24  ;;  %925 = vrot.lane.b32.xlu0 %v890_v49, %s1796_s7  ;;  %v1164_v49 = vmul.f32 %v1117_v36, %v2260_v2 }
 0x1dd   :  { %459 = vperm.xlu1 %1674, %v2079_v5  }
 0x1df   :  { %v2222_v55 = vpop.permute.xlu1 %1012 }
 0x1e0   :  { %2949 = vst [vmem:[#allocation19_spill] sm:$0xff] %v2222_v55  ;;  %1197 = vrot.lane.b32.xlu0 %v1162_v54, %s1795_s6  ;;  %v689_v54 = vpop.permute.xlu0 %688  ;;  %v2310_v55 = vld [vmem:[#allocation4 + $0x80] sm:$0xff] }
 0x1e1   :  { %1675 = vset.pattern.permute.xlu1 %v1788_v0 }
 0x1e2   :  { %544 = vperm.xlu1 %1675, %v2079_v5  }
 0x1e4   :  { %v2228_v44 = vpop.permute.xlu1 %429  ;;  %767 = vrot.lane.b32.xlu0 %v731_v56, %s1794_s1  ;;  %v733_v56 = vmul.f32 %v689_v54, %v2264_v47 }
 0x1e5   :  { %2950 = vst [vmem:[#allocation20_spill] sm:$0xff] %v2228_v44 }
 0x1e6   :  { %1677 = vset.pattern.permute.xlu1 %v1791_v20 }
 0x1e7   :  { %864 = vperm.xlu1 %1677, %v2079_v5  }
 0x1e9   :  { %v2233_v12 = vpop.permute.xlu1 %520 }
 0x1eb   :  { %1679 = vset.pattern.permute.xlu1 %v2925_v24 }
 0x1ec   :  { %464 = vperm.xlu1 %1679, %v2089_v6  }
 0x1ee   :  { %v2237_v13 = vpop.permute.xlu1 %840 }
 0x1f0   :  { %1680 = vset.pattern.permute.xlu1 %v1788_v0 }
 0x1f1   :  { %548 = vperm.xlu1 %1680, %v2089_v6  }
 0x1f3   :  { %v2241_v17 = vpop.permute.xlu1 %1112 }
 0x1f5   :  { %1681 = vset.pattern.permute.xlu1 %v2924_v51 }
 0x1f6   :  { %708 = vperm.xlu1 %1681, %v2089_v6  }
 0x1f8   :  { %v2247_v21 = vpop.permute.xlu1 %434 }
 0x1f9   :  { %2952 = vst [vmem:[#allocation22_spill] sm:$0xff] %v2247_v21  ;;  %v2964_v21 = vmov 5  }
 0x1fa   :  { %1683 = vset.pattern.permute.xlu1 %v2923_v14 }
 0x1fb   :  { %1044 = vperm.xlu1 %1683, %v2089_v6  }
 0x1fd   :  { %v525_v48 = vpop.permute.xlu1 %524 }
 0x1fe   :  { %v572_v33 = vmul.f32 %v525_v48, %v2251_v30 }
 0x1ff   :  { %1684 = vset.pattern.permute.xlu1 %v2925_v24 }
 0x200   :  { %469 = vperm.xlu1 %1684, %v2095_v7   ;;  %609 = vrot.lane.b32.xlu0 %v572_v33, %s1795_s6 }
 0x202   :  { %v2258_v46 = vpop.permute.xlu1 %684 }
 0x204   :  { %1687 = vset.pattern.permute.xlu1 %v1791_v20  ;;  %929 = vrot.lane.b32.xlu0 %v892_v26, %s1796_s7  ;;  %v2289_v26 = vpop.permute.xlu0 %1024 }
 0x205   :  { %872 = vperm.xlu1 %1687, %v2095_v7   ;;  %2956 = vst [vmem:[#allocation26_spill] sm:$0xff] %v2289_v26  ;;  %v2960_v26 = vmov 0  }
 0x207   :  { %v2268_v10 = vpop.permute.xlu1 %1020 }
 0x208   :  { %2954 = vst [vmem:[#allocation24_spill] sm:$0xff] %v2268_v10  ;;  %1201 = vrot.lane.b32.xlu0 %v1164_v49, %s1795_s6  ;;  %v853_v54 = vpop.permute.xlu0 %852 }
 0x209   :  { %1689 = vset.pattern.permute.xlu1 %v2925_v24 }
 0x20a   :  { %474 = vperm.xlu1 %1689, %v2109_v8  }
 0x20c   :  { %v2274_v28 = vpop.permute.xlu1 %439  ;;  %771 = vrot.lane.b32.xlu0 %v733_v56, %s1794_s1  ;;  %v2297_v56 = vld [vmem:[#allocation4 + $0x70] sm:$0xff] }
 0x20d   :  { %2955 = vst [vmem:[#allocation25_spill] sm:$0xff] %v2274_v28  ;;  %2958 = vst [vmem:[#allocation28_spill] sm:$0xff] %v2297_v56 }
 0x20e   :  { %1690 = vset.pattern.permute.xlu1 %v1788_v0 }
 0x20f   :  { %556 = vperm.xlu1 %1690, %v2109_v8  }
 0x211   :  { %v2279_v48 = vpop.permute.xlu1 %528 }
 0x212   :  { %v573_v29 = vmul.f32 %v2279_v48, %v2264_v47 }
 0x213   :  { %1691 = vset.pattern.permute.xlu1 %v2924_v51  ;;  %v1125_v51 = vpop.permute.xlu0 %1124 }
 0x214   :  { %716 = vperm.xlu1 %1691, %v2109_v8  }
 0x216   :  { %v2283_v33 = vpop.permute.xlu1 %848 }
 0x218   :  { %1693 = vset.pattern.permute.xlu1 %v2923_v14 }
 0x219   :  { %1052 = vperm.xlu1 %1693, %v2109_v8  }
 0x21b   :  { %v2287_v36 = vpop.permute.xlu1 %1120 }
 0x21d   :  { %1694 = vset.pattern.permute.xlu1 %v2925_v24  ;;  %v894_v24 = vmul.f32 %v853_v54, %v2297_v56 }
 0x21e   :  { %479 = vperm.xlu1 %1694, %v2117_v11  }
 0x220   :  { %v2293_v49 = vpop.permute.xlu1 %444 }
 0x221   :  { %2957 = vst [vmem:[#allocation27_spill] sm:$0xff] %v2293_v49 }
 0x222   :  { %1695 = vset.pattern.permute.xlu1 %v1788_v0  ;;  %v2306_v0 = vld [vmem:[#allocation4 + $0x78] sm:$0xff] }
 0x223   :  { %560 = vperm.xlu1 %1695, %v2117_v11   ;;  %2959 = vst [vmem:[#allocation29_spill] sm:$0xff] %v2306_v0 }
 0x225   :  { %v533_v4 = vpop.permute.xlu1 %532 }
 0x226   :  { %v574_v14 = vmul.f32 %v533_v4, %v2297_v56  ;;  %v1797_v4 = vmov 6  }
 0x227   :  { %1697 = vset.pattern.permute.xlu1 %v1791_v20  ;;  %v1166_v20 = vmul.f32 %v1125_v51, %v2306_v0  ;;  %1707 = vset.pattern.permute.xlu0 %v1797_v4 }
 0x228   :  { %880 = vperm.xlu1 %1697, %v2117_v11   ;;  %613 = vrot.lane.b32.xlu0 %v574_v14, %s1795_s6  ;;  %v697_v14 = vpop.permute.xlu0 %696 }
 0x229   :  { %v735_v54 = vmul.f32 %v697_v14, %v2310_v55 }
 0x22a   :  { %v2304_v10 = vpop.permute.xlu1 %692 }
 0x22c   :  { %1699 = vset.pattern.permute.xlu1 %v2960_v26  ;;  %933 = vrot.lane.b32.xlu0 %v894_v24, %s1796_s7  ;;  %v2963_v26 = vmov 4  }
 0x22d   :  { %484 = vperm.xlu1 %1699, %v2129_v22  }
 0x22f   :  { %v2314_v49 = vpop.permute.xlu1 %1028 }
 0x230   :  { %2961 = vst [vmem:[#allocation30_spill] sm:$0xff] %v2314_v49  ;;  %1205 = vrot.lane.b32.xlu0 %v1166_v20, %s1795_s6  ;;  %v2328_v49 = vpop.permute.xlu0 %1032 }
 0x231   :  { %1701 = vset.pattern.permute.xlu1 %v2962_v40 }
 0x232   :  { %724 = vperm.xlu1 %1701, %v2129_v22  }
 0x234   :  { %v2320_v24 = vpop.permute.xlu1 %449  ;;  %775 = vrot.lane.b32.xlu0 %v735_v54, %s1794_s1  ;;  %v861_v40 = vpop.permute.xlu0 %860  ;;  %v567_v54 = vmul.f32 %v2115_v9, %v2149_v19 }
 0x236   :  { %1703 = vset.pattern.permute.xlu1 %v2963_v26 }
 0x237   :  { %1060 = vperm.xlu1 %1703, %v2129_v22  }
 0x238   :  { %v1133_v26 = vpop.permute.xlu0 %1132 }
 0x239   :  { %v2325_v51 = vpop.permute.xlu1 %536 }
 0x23b   :  { %1704 = vset.pattern.permute.xlu1 %v2964_v21  ;;  %v887_v21 = vmul.f32 %v2174_v34, %v2149_v19  ;;  %v728_v19 = vmul.f32 %v2192_v57, %v2157_v27  ;;  %v896_v34 = vmul.f32 %v861_v40, %v2347_v16  ;;  %v889_v57 = vmul.f32 %v2182_v25, %v2178_v35 }
 0x23c   :  { %1136 = vperm.xlu1 %1704, %v2079_v5   ;;  %v705_v9 = vpop.permute.xlu0 %704  ;;  %v571_v25 = vmul.f32 %v2233_v12, %v2218_v52  ;;  %v2409_v12 = vld [vmem:[#allocation4 + $0xb0] sm:$0xff] }
 0x23e   :  { %v2331_v20 = vpop.permute.xlu1 %856 }
 0x240   :  { %1144 = vperm.xlu1 %1704, %v2095_v7  }
 0x243   :  { %v2334_v14 = vpop.permute.xlu1 %1128 }
 0x244   :  { %1152 = vperm.xlu1 %1704, %v2117_v11  }
 0x248   :  { %v2339_v28 = vpop.permute.xlu1 %454  ;;  %599 = vrot.lane.b32.xlu1 %v567_v54, %s1795_s6  ;;  %v2359_v54 = vld [vmem:[#allocation4 + $0x98] sm:$0xff] }
 0x249   :  { %1706 = vset.pattern.permute.xlu1 %v1797_v4  ;;  %2965 = vst [vmem:[#allocation31_spill] sm:$0xff] %v2359_v54 }
 0x24c   :  { %919 = vrot.lane.b32.xlu1 %v887_v21, %s1796_s7  ;;  %v2361_v21 = vpop.permute.xlu0 %1040 }
 0x24d   :  { %v541_v38 = vpop.permute.xlu1 %540 }
 0x24e   :  { %v576_v41 = vmul.f32 %v541_v38, %v2347_v16  ;;  %v737_v38 = vmul.f32 %v705_v9, %v2365_v37 }
 0x250   :  { %1191 = vrot.lane.b32.xlu1 %v1159_v15, %s1795_s6  ;;  %617 = vrot.lane.b32.xlu0 %v576_v41, %s1795_s6  ;;  %v569_v15 = vmul.f32 %v2165_v23, %v2178_v35  ;;  %v1168_v41 = vmul.f32 %v1133_v26, %v2359_v54  ;;  %v869_v40 = vpop.permute.xlu0 %868  ;;  %v2381_v23 = vld [vmem:[#allocation4 + $0x28] sm:$0xff]  ;;  %v730_v35 = vmul.f32 %v2212_v50, %v2205_v45 }
 0x251   :  { %v1161_v26 = vmul.f32 %v2195_v39, %v2381_v23  ;;  %v891_v39 = vmul.f32 %v2237_v13, %v2218_v52  ;;  %v2405_v45 = vld [vmem:[#allocation4 + $0x48] sm:$0xff]  ;;  %v732_v13 = vmul.f32 %v2258_v46, %v2251_v30  ;;  %v893_v30 = vmul.f32 %v2283_v33, %v2264_v47  ;;  %v2494_v52 = vld [vmem:[#allocation4 + $0xd8] sm:$0xff] }
 0x252   :  { %v2357_v4 = vpop.permute.xlu1 %700  ;;  %v1163_v50 = vmul.f32 %v2241_v17, %v2405_v45 }
 0x254   :  { %761 = vrot.lane.b32.xlu1 %v728_v19, %s1794_s1  ;;  %937 = vrot.lane.b32.xlu0 %v896_v34, %s1796_s7  ;;  %v2385_v9 = vpop.permute.xlu0 %552 }
 0x257   :  { %v2370_v27 = vpop.permute.xlu1 %1036 }
 0x258   :  { %2966 = vst [vmem:[#allocation32_spill] sm:$0xff] %v2370_v27  ;;  %603 = vrot.lane.b32.xlu1 %v569_v15, %s1795_s6  ;;  %1209 = vrot.lane.b32.xlu0 %v1168_v41, %s1795_s6  ;;  %v713_v15 = vpop.permute.xlu0 %712  ;;  %v2416_v27 = vld [vmem:[#allocation4 + $0xc0] sm:$0xff] }
 0x259   :  { %v579_v2 = vmul.f32 %v2385_v9, %v2416_v27 }
 0x25c   :  { %v2377_v19 = vpop.permute.xlu1 %459  ;;  %923 = vrot.lane.b32.xlu1 %v889_v57, %s1796_s7  ;;  %779 = vrot.lane.b32.xlu0 %v737_v38, %s1794_s1  ;;  %v2402_v57 = vpop.permute.xlu0 %1048 }
 0x260   :  { %1195 = vrot.lane.b32.xlu1 %v1161_v26, %s1795_s6 }
 0x261   :  { %v2388_v34 = vpop.permute.xlu1 %544 }
 0x264   :  { %765 = vrot.lane.b32.xlu1 %v730_v35, %s1794_s1 }
 0x266   :  { %v2395_v41 = vpop.permute.xlu1 %864 }
 0x268   :  { %607 = vrot.lane.b32.xlu1 %v571_v25, %s1795_s6  ;;  %v877_v25 = vpop.permute.xlu0 %876 }
 0x26b   :  { %v2400_v38 = vpop.permute.xlu1 %464 }
 0x26c   :  { %927 = vrot.lane.b32.xlu1 %v891_v39, %s1796_s7  ;;  %v898_v39 = vmul.f32 %v869_v40, %v2409_v12  ;;  %v2433_v40 = vld [vmem:[#allocation4 + $0x68] sm:$0xff] }
 0x26d   :  { %v1165_v48 = vmul.f32 %v2287_v36, %v2433_v40 }
 0x270   :  { %v549_v26 = vpop.permute.xlu1 %548  ;;  %1199 = vrot.lane.b32.xlu1 %v1163_v50, %s1795_s6  ;;  %v739_v50 = vmul.f32 %v713_v15, %v2416_v27 }
 0x271   :  { %v578_v35 = vmul.f32 %v549_v26, %v2409_v12  ;;  %v721_v26 = vpop.permute.xlu0 %720 }
 0x273   :  { %621 = vrot.lane.b32.xlu0 %v578_v35, %s1795_s6 }
 0x274   :  { %769 = vrot.lane.b32.xlu1 %v732_v13, %s1794_s1  ;;  %v575_v13 = vmul.f32 %v2325_v51, %v2310_v55 }
 0x275   :  { %v2420_v17 = vpop.permute.xlu1 %708  ;;  %v2435_v35 = vpop.permute.xlu0 %1056 }
 0x276   :  { %v738_v0 = vmul.f32 %v2420_v17, %v2409_v12 }
 0x277   :  { %941 = vrot.lane.b32.xlu0 %v898_v39, %s1796_s7 }
 0x278   :  { %611 = vrot.lane.b32.xlu1 %v573_v29, %s1795_s6  ;;  %v734_v29 = vmul.f32 %v2304_v10, %v2297_v56  ;;  %v2457_v10 = vld [vmem:[#allocation4 + $0xd0] sm:$0xff] }
 0x279   :  { %v565_v47 = vpop.permute.xlu0 %564 }
 0x27a   :  { %v2429_v46 = vpop.permute.xlu1 %1044 }
 0x27b   :  { %783 = vrot.lane.b32.xlu0 %v739_v50, %s1794_s1  ;;  %v895_v50 = vmul.f32 %v2331_v20, %v2310_v55  ;;  %v736_v20 = vmul.f32 %v2357_v4, %v2347_v16 }
 0x27c   :  { %931 = vrot.lane.b32.xlu1 %v893_v30, %s1796_s7  ;;  %v2455_v30 = vld [vmem:[#allocation4 + $0x88] sm:$0xff] }
 0x27d   :  { %v885_v36 = vpop.permute.xlu0 %884 }
 0x27f   :  { %v2439_v15 = vpop.permute.xlu1 %469 }
 0x280   :  { %1203 = vrot.lane.b32.xlu1 %v1165_v48, %s1795_s6  ;;  %v1167_v48 = vmul.f32 %v2334_v14, %v2455_v30 }
 0x281   :  { %v1141_v56 = vpop.permute.xlu0 %1140 }
 0x284   :  { %v2444_v33 = vpop.permute.xlu1 %872  ;;  %773 = vrot.lane.b32.xlu1 %v734_v29, %s1794_s1 }
 0x285   :  { %v1149_v44 = vpop.permute.xlu0 %1148 }
 0x288   :  { %615 = vrot.lane.b32.xlu1 %v575_v13, %s1795_s6  ;;  %v2464_v13 = vld [vmem:[#allocation4 + $0xe0] sm:$0xff] }
 0x289   :  { %v2450_v39 = vpop.permute.xlu1 %474  ;;  %v741_v14 = vmul.f32 %v721_v26, %v2464_v13  ;;  %v1157_v26 = vpop.permute.xlu0 %1156 }
 0x28c   :  { %935 = vrot.lane.b32.xlu1 %v895_v50, %s1796_s7  ;;  %v900_v50 = vmul.f32 %v877_v25, %v2457_v10  ;;  %v897_v25 = vmul.f32 %v2395_v41, %v2365_v37  ;;  %v2497_v41 = vld [vmem:[#allocation4 + $0xf8] sm:$0xff] }
 0x28e   :  { %v557_v29 = vpop.permute.xlu1 %556 }
 0x28f   :  { %v580_v51 = vmul.f32 %v557_v29, %v2457_v10  ;;  %v2472_v29 = vld [vmem:[#allocation4 + $0xf0] sm:$0xff] }
 0x290   :  { %1207 = vrot.lane.b32.xlu1 %v1167_v48, %s1795_s6  ;;  %v577_v48 = vmul.f32 %v2388_v34, %v2365_v37  ;;  %v582_v4 = vmul.f32 %v565_v47, %v2472_v29  ;;  %v2488_v34 = vld [vmem:[#allocation4 + $0xb8] sm:$0xff] }
 0x291   :  { %625 = vrot.lane.b32.xlu0 %v580_v51, %s1795_s6 }
 0x293   :  { %v717_v18 = vpop.permute.xlu1 %716 }
 0x294   :  { %777 = vrot.lane.b32.xlu1 %v736_v20, %s1794_s1  ;;  %v902_v20 = vmul.f32 %v885_v36, %v2472_v29  ;;  %v1172_v36 = vmul.f32 %v1149_v44, %v2494_v52  ;;  %v740_v9 = vmul.f32 %v717_v18, %v2457_v10 }
 0x295   :  { %945 = vrot.lane.b32.xlu0 %v900_v50, %s1796_s7 }
 0x298   :  { %v2476_v51 = vpop.permute.xlu1 %1052  ;;  %619 = vrot.lane.b32.xlu1 %v577_v48, %s1795_s6  ;;  %v2491_v48 = vpop.permute.xlu0 %759 }
 0x299   :  { %787 = vrot.lane.b32.xlu0 %v741_v14, %s1794_s1  ;;  %2967 = vst [vmem:[#allocation33_spill] sm:$0xff] %v2491_v48  ;;  %v1170_v14 = vmul.f32 %v1141_v56, %v2488_v34 }
 0x29c   :  { %939 = vrot.lane.b32.xlu1 %v897_v25, %s1796_s7  ;;  %v2500_v54 = vpop.permute.xlu0 %601 }
 0x29d   :  { %v2485_v50 = vpop.permute.xlu1 %479  ;;  %629 = vrot.lane.b32.xlu0 %v582_v4, %s1795_s6  ;;  %2968 = vst [vmem:[#allocation34_spill] sm:$0xff] %v2500_v54  ;;  %v1174_v4 = vmul.f32 %v1157_v26, %v2497_v41 }
 0x2a0   :  { %v2507_v56 = vpop.permute.xlu0 %921 }
 0x2a1   :  { %949 = vrot.lane.b32.xlu0 %v902_v20, %s1796_s7  ;;  %2969 = vst [vmem:[#allocation35_spill] sm:$0xff] %v2507_v56 }
 0x2a2   :  { %v561_v47 = vpop.permute.xlu1 %560 }
 0x2a5   :  { %1213 = vrot.lane.b32.xlu0 %v1170_v14, %s1795_s6  ;;  %v2510_v14 = vpop.permute.xlu0 %1193 }
 0x2a6   :  { %2970 = vst [vmem:[#allocation36_spill] sm:$0xff] %v2510_v14 }
 0x2a7   :  { %v881_v25 = vpop.permute.xlu1 %880 }
 0x2a9   :  { %1217 = vrot.lane.b32.xlu0 %v1172_v36, %s1795_s6  ;;  %v2516_v26 = vpop.permute.xlu0 %763  ;;  %v2518_v36 = vld [vmem:[#allocation4 + $0xa8] sm:$0xff] }
 0x2aa   :  { %2971 = vst [vmem:[#allocation37_spill] sm:$0xff] %v2516_v26 }
 0x2ac   :  { %v2504_v20 = vpop.permute.xlu1 %484 }
 0x2ad   :  { %1221 = vrot.lane.b32.xlu0 %v1174_v4, %s1795_s6  ;;  %v2522_v56 = vpop.permute.xlu0 %605 }
 0x2ae   :  { %2972 = vst [vmem:[#allocation38_spill] sm:$0xff] %v2522_v56 }
 0x2b1   :  { %v725_v48 = vpop.permute.xlu1 %724  ;;  %1260 = vperm.xlu0 %1707, %v1997_v32   ;;  %v2531_v43 = vpop.permute.xlu0 %925 }
 0x2b2   :  { %2973 = vst [vmem:[#allocation39_spill] sm:$0xff] %v2531_v43  ;;  %v1798_v43 = vmov 7  }
 0x2b5   :  { %1272 = vperm.xlu0 %1707, %v2019_v61   ;;  %v2540_v17 = vpop.permute.xlu0 %1197 }
 0x2b6   :  { %v2513_v44 = vpop.permute.xlu1 %1060  ;;  %2975 = vst [vmem:[#allocation41_spill] sm:$0xff] %v2540_v17 }
 0x2b9   :  { %1280 = vperm.xlu0 %1707, %v2039_v62   ;;  %v2546_v56 = vpop.permute.xlu0 %767 }
 0x2ba   :  { %2977 = vst [vmem:[#allocation43_spill] sm:$0xff] %v2546_v56 }
 0x2bb   :  { %v1137_v54 = vpop.permute.xlu1 %1136 }
 0x2bc   :  { %v1169_v4 = vmul.f32 %v1137_v54, %v2518_v36 }
 0x2bd   :  { %1288 = vperm.xlu0 %1707, %v2059_v1  }
 0x2be   :  { %1211 = vrot.lane.b32.xlu1 %v1169_v4, %s1795_s6  ;;  %v899_v4 = vmul.f32 %v2444_v33, %v2416_v27  ;;  %v581_v33 = vmul.f32 %v561_v47, %v2464_v13 }
 0x2bf   :  { %v1145_v14 = vpop.permute.xlu1 %1144 }
 0x2c1   :  { %1296 = vperm.xlu0 %1707, %v2079_v5  }
 0x2c2   :  { %781 = vrot.lane.b32.xlu1 %v738_v0, %s1794_s1 }
 0x2c3   :  { %v1153_v26 = vpop.permute.xlu1 %1152 }
 0x2c5   :  { %1304 = vperm.xlu0 %1707, %v2095_v7  }
 0x2c6   :  { %623 = vrot.lane.b32.xlu1 %v579_v2, %s1795_s6 }
 0x2c7   :  { %v2535_v54 = vpop.permute.xlu1 %599 }
 0x2c8   :  { %2974 = vst [vmem:[#allocation40_spill] sm:$0xff] %v2535_v54  ;;  %v2552_v54 = vpop.permute.xlu0 %609 }
 0x2c9   :  { %1312 = vperm.xlu0 %1707, %v2117_v11   ;;  %2979 = vst [vmem:[#allocation45_spill] sm:$0xff] %v2552_v54 }
 0x2ca   :  { %943 = vrot.lane.b32.xlu1 %v899_v4, %s1796_s7  ;;  %v901_v4 = vmul.f32 %v881_v25, %v2464_v13  ;;  %v2573_v25 = vld [vmem:[#allocation4 + $0xe8] sm:$0xff] }
 0x2cb   :  { %v2543_v0 = vpop.permute.xlu1 %919 }
 0x2cc   :  { %2976 = vst [vmem:[#allocation42_spill] sm:$0xff] %v2543_v0  ;;  %v2561_v0 = vpop.permute.xlu0 %929 }
 0x2cd   :  { %1709 = vset.pattern.permute.xlu0 %v1798_v43  ;;  %2982 = vst [vmem:[#allocation48_spill] sm:$0xff] %v2561_v0  ;;  %v1173_v0 = vmul.f32 %v1153_v26, %v2573_v25 }
 0x2ce   :  { %785 = vrot.lane.b32.xlu1 %v740_v9, %s1794_s1  ;;  %v742_v9 = vmul.f32 %v725_v48, %v2472_v29 }
 0x2cf   :  { %v2549_v2 = vpop.permute.xlu1 %1191 }
 0x2d0   :  { %2978 = vst [vmem:[#allocation44_spill] sm:$0xff] %v2549_v2  ;;  %v2565_v2 = vld [vmem:[#allocation4 + $0xc8] sm:$0xff]  ;;  %v2570_v54 = vpop.permute.xlu0 %1201 }
 0x2d1   :  { %2984 = vst [vmem:[#allocation50_spill] sm:$0xff] %v2570_v54 }
 0x2d2   :  { %627 = vrot.lane.b32.xlu1 %v581_v33, %s1795_s6  ;;  %v1171_v33 = vmul.f32 %v1145_v14, %v2565_v2 }
 0x2d3   :  { %v2555_v17 = vpop.permute.xlu1 %761 }
 0x2d4   :  { %2980 = vst [vmem:[#allocation46_spill] sm:$0xff] %v2555_v17  ;;  %v2578_v17 = vpop.permute.xlu0 %771 }
 0x2d5   :  { %2986 = vst [vmem:[#allocation52_spill] sm:$0xff] %v2578_v17 }
 0x2d6   :  { %947 = vrot.lane.b32.xlu1 %v901_v4, %s1796_s7 }
 0x2d7   :  { %v2559_v18 = vpop.permute.xlu1 %603 }
 0x2d8   :  { %2981 = vst [vmem:[#allocation47_spill] sm:$0xff] %v2559_v18 }
 0x2da   :  { %789 = vrot.lane.b32.xlu1 %v742_v9, %s1794_s1  ;;  %v2583_v9 = vpop.permute.xlu0 %613 }
 0x2db   :  { %v2567_v47 = vpop.permute.xlu1 %923  ;;  %2988 = vst [vmem:[#allocation54_spill] sm:$0xff] %v2583_v9 }
 0x2dc   :  { %2983 = vst [vmem:[#allocation49_spill] sm:$0xff] %v2567_v47 }
 0x2de   :  { %1215 = vrot.lane.b32.xlu1 %v1171_v33, %s1795_s6  ;;  %v2591_v54 = vpop.permute.xlu0 %933 }
 0x2df   :  { %v2575_v4 = vpop.permute.xlu1 %1195  ;;  %2991 = vst [vmem:[#allocation57_spill] sm:$0xff] %v2591_v54 }
 0x2e0   :  { %2985 = vst [vmem:[#allocation51_spill] sm:$0xff] %v2575_v4 }
 0x2e2   :  { %1219 = vrot.lane.b32.xlu1 %v1173_v0, %s1795_s6  ;;  %v2596_v17 = vpop.permute.xlu0 %1205 }
 0x2e3   :  { %v2581_v48 = vpop.permute.xlu1 %765  ;;  %2993 = vst [vmem:[#allocation59_spill] sm:$0xff] %v2596_v17 }
 0x2e4   :  { %2987 = vst [vmem:[#allocation53_spill] sm:$0xff] %v2581_v48 }
 0x2e6   :  { %1256 = vperm.xlu1 %1706, %v1985_v58   ;;  %v776_v9 = vpop.permute.xlu0 %775 }
 0x2e7   :  { %v2586_v14 = vpop.permute.xlu1 %607 }
 0x2e8   :  { %2989 = vst [vmem:[#allocation55_spill] sm:$0xff] %v2586_v14 }
 0x2ea   :  { %1264 = vperm.xlu1 %1706, %v2003_v59   ;;  %v618_v4 = vpop.permute.xlu0 %617 }
 0x2eb   :  { %v2589_v33 = vpop.permute.xlu1 %927 }
 0x2ec   :  { %2990 = vst [vmem:[#allocation56_spill] sm:$0xff] %v2589_v33 }
 0x2ee   :  { %1268 = vperm.xlu1 %1706, %v2009_v60   ;;  %v2610_v18 = vpop.permute.xlu0 %937 }
 0x2ef   :  { %v2594_v26 = vpop.permute.xlu1 %1199  ;;  %2998 = vst [vmem:[#allocation64_spill] sm:$0xff] %v2610_v18  ;;  %v1071_v18 = vmul.f32 %v2328_v49, %v2455_v30  ;;  %v497_v49 = vmul.f32 %v2377_v19, %v2365_v37 }
 0x2f0   :  { %2992 = vst [vmem:[#allocation58_spill] sm:$0xff] %v2594_v26 }
 0x2f2   :  { %1276 = vperm.xlu1 %1706, %v2029_v53   ;;  %v2617_v26 = vpop.permute.xlu0 %1209 }
 0x2f3   :  { %v2599_v0 = vpop.permute.xlu1 %769 }
 0x2f4   :  { %2994 = vst [vmem:[#allocation60_spill] sm:$0xff] %v2599_v0  ;;  %v495_v0 = vmul.f32 %v2320_v24, %v2310_v55  ;;  %v496_v55 = vmul.f32 %v2339_v28, %v2347_v16 }
 0x2f6   :  { %1284 = vperm.xlu1 %1706, %v2049_v63  }
 0x2f7   :  { %v2602_v48 = vpop.permute.xlu1 %611 }
 0x2f8   :  { %2995 = vst [vmem:[#allocation61_spill] sm:$0xff] %v2602_v48 }
 0x2fa   :  { %1292 = vperm.xlu1 %1706, %v2069_v3  }
 0x2fb   :  { %v2605_v47 = vpop.permute.xlu1 %931 }
 0x2fc   :  { %2996 = vst [vmem:[#allocation62_spill] sm:$0xff] %v2605_v47  ;;  %v780_v47 = vpop.permute.xlu0 %779 }
 0x2fe   :  { %1300 = vperm.xlu1 %1706, %v2089_v6  }
 0x2ff   :  { %v2608_v54 = vpop.permute.xlu1 %1203 }
 0x300   :  { %2997 = vst [vmem:[#allocation63_spill] sm:$0xff] %v2608_v54 }
 0x302   :  { %1308 = vperm.xlu1 %1706, %v2109_v8  }
 0x303   :  { %v2613_v17 = vpop.permute.xlu1 %773 }
 0x304   :  { %2999 = vst [vmem:[#allocation65_spill] sm:$0xff] %v2613_v17  ;;  %v622_v17 = vpop.permute.xlu0 %621 }
 0x306   :  { %1316 = vperm.xlu1 %1706, %v2129_v22  }
 0x307   :  { %v616_v48 = vpop.permute.xlu1 %615 }
 0x308   :  { %v655_v33 = vadd.f32 %v616_v48, %v495_v0  ;;  %v656_v48 = vadd.f32 %v618_v4, %v496_v55 }
 0x30a   :  { %1708 = vset.pattern.permute.xlu1 %v1798_v43  ;;  %v815_v56 = vadd.f32 %v776_v9, %v655_v33  ;;  %v942_v9 = vpop.permute.xlu0 %941 }
 0x30b   :  { %v936_v14 = vpop.permute.xlu1 %935  ;;  %1416 = vperm.xlu1 %1708, %v1985_v58  }
 0x30c   :  { %v975_v54 = vadd.f32 %v936_v14, %v815_v56 }
 0x30e   :  { %v1087_v31 = vadd.f32 %v1071_v18, %v975_v54  ;;  %v784_v54 = vpop.permute.xlu0 %783 }
 0x30f   :  { %v1208_v11 = vpop.permute.xlu1 %1207  ;;  %1424 = vperm.xlu1 %1708, %v2003_v59  }
 0x310   :  { %v2626_v24 = vadd.f32 %v1208_v11, %v1087_v31 }
 0x312   :  { %v626_v11 = vpop.permute.xlu0 %625 }
 0x313   :  { %v778_v43 = vpop.permute.xlu1 %777  ;;  %1428 = vperm.xlu1 %1708, %v2009_v60  }
 0x314   :  { %v2629_v58 = vadd.f32 %v778_v43, %v656_v48 }
 0x316   :  { %v946_v60 = vpop.permute.xlu0 %945 }
 0x317   :  { %v620_v56 = vpop.permute.xlu1 %619  ;;  %1436 = vperm.xlu1 %1708, %v2029_v53   ;;  %v1073_v53 = vmul.f32 %v2361_v21, %v2518_v36 }
 0x318   :  { %v657_v59 = vadd.f32 %v620_v56, %v497_v49 }
 0x31a   :  { %v817_v18 = vadd.f32 %v780_v47, %v657_v59  ;;  %v788_v31 = vpop.permute.xlu0 %787 }
 0x31b   :  { %v940_v14 = vpop.permute.xlu1 %939  ;;  %1444 = vperm.xlu1 %1708, %v2049_v63   ;;  %v498_v63 = vmul.f32 %v2400_v38, %v2409_v12  ;;  %v500_v12 = vmul.f32 %v2450_v39, %v2457_v10  ;;  %v502_v39 = vmul.f32 %v2504_v20, %v2472_v29 }
 0x31c   :  { %v977_v16 = vadd.f32 %v940_v14, %v817_v18 }
 0x31d   :  { %v660_v59 = vadd.f32 %v626_v11, %v500_v12 }
 0x31e   :  { %v630_v28 = vpop.permute.xlu0 %629  ;;  %v1089_v37 = vadd.f32 %v1073_v53, %v977_v16 }
 0x31f   :  { %1452 = vperm.xlu1 %1708, %v2069_v3   ;;  %v658_v3 = vadd.f32 %v622_v17, %v498_v63  ;;  %v662_v11 = vadd.f32 %v630_v28, %v502_v39 }
 0x322   :  { %v950_v4 = vpop.permute.xlu0 %949 }
 0x323   :  { %1460 = vperm.xlu1 %1708, %v2089_v6  }
 0x326   :  { %v1214_v43 = vpop.permute.xlu0 %1213 }
 0x327   :  { %1468 = vperm.xlu1 %1708, %v2109_v8   ;;  %v1074_v8 = vmul.f32 %v2429_v46, %v2488_v34  ;;  %v1076_v46 = vmul.f32 %v2476_v51, %v2494_v52  ;;  %v1075_v51 = vmul.f32 %v2402_v57, %v2565_v2 }
 0x32a   :  { %v1218_v53 = vpop.permute.xlu0 %1217 }
 0x32b   :  { %1476 = vperm.xlu1 %1708, %v2129_v22   ;;  %v499_v22 = vmul.f32 %v2439_v15, %v2416_v27  ;;  %v501_v27 = vmul.f32 %v2485_v50, %v2464_v13  ;;  %v1078_v13 = vmul.f32 %v2513_v44, %v2497_v41 }
 0x32e   :  { %v1222_v29 = vpop.permute.xlu0 %1221 }
 0x330   :  { %v1212_v19 = vpop.permute.xlu1 %1211 }
 0x331   :  { %v2643_v47 = vadd.f32 %v1212_v19, %v1089_v37 }
 0x332   :  { %v1261_v57 = vpop.permute.xlu0 %1260 }
 0x334   :  { %v782_v33 = vpop.permute.xlu1 %781 }
 0x335   :  { %v818_v6 = vadd.f32 %v782_v33, %v658_v3 }
 0x337   :  { %v978_v0 = vadd.f32 %v942_v9, %v818_v6 }
 0x338   :  { %v624_v21 = vpop.permute.xlu1 %623 }
 0x339   :  { %v659_v55 = vadd.f32 %v624_v21, %v499_v22  ;;  %v1090_v48 = vadd.f32 %v1074_v8, %v978_v0 }
 0x33b   :  { %v819_v49 = vadd.f32 %v784_v54, %v659_v55  ;;  %v2649_v56 = vadd.f32 %v1214_v43, %v1090_v48  ;;  %v1273_v55 = vpop.permute.xlu0 %1272 }
 0x33c   :  { %v944_v38 = vpop.permute.xlu1 %943  ;;  %v1323_v12 = vmul.f32 %v1273_v55, %v2405_v45 }
 0x33d   :  { %v979_v17 = vadd.f32 %v944_v38, %v819_v49 }
 0x340   :  { %v786_v18 = vpop.permute.xlu1 %785 }
 0x341   :  { %v820_v14 = vadd.f32 %v786_v18, %v660_v59 }
 0x343   :  { %v980_v15 = vadd.f32 %v946_v60, %v820_v14  ;;  %v1091_v60 = vadd.f32 %v1075_v51, %v979_v17 }
 0x344   :  { %v628_v9 = vpop.permute.xlu1 %627 }
 0x345   :  { %v661_v16 = vadd.f32 %v628_v9, %v501_v27  ;;  %v1092_v54 = vadd.f32 %v1076_v46, %v980_v15 }
 0x347   :  { %v821_v37 = vadd.f32 %v788_v31, %v661_v16  ;;  %v2657_v19 = vadd.f32 %v1218_v53, %v1092_v54  ;;  %v1077_v31 = vmul.f32 %v2435_v35, %v2573_v25  ;;  %v3000_v54 = vld [vmem:[#allocation8_spill] sm:$0xff] }
 0x348   :  { %v948_v63 = vpop.permute.xlu1 %947 }
 0x349   :  { %v981_v10 = vadd.f32 %v948_v63, %v821_v37  ;;  %v3001_v37 = vld [vmem:[#allocation13_spill] sm:$0xff] }
 0x34a   :  { %v3002_v63 = vld [vmem:[#allocation17_spill] sm:$0xff] }
 0x34b   :  { %v1093_v20 = vadd.f32 %v1077_v31, %v981_v10 }
 0x34c   :  { %v790_v3 = vpop.permute.xlu1 %789 }
 0x34d   :  { %v822_v33 = vadd.f32 %v790_v3, %v662_v11 }
 0x34f   :  { %v982_v50 = vadd.f32 %v950_v4, %v822_v33  ;;  %v1281_v4 = vpop.permute.xlu0 %1280 }
 0x350   :  { %v1216_v6 = vpop.permute.xlu1 %1215  ;;  %v1325_v59 = vmul.f32 %v1281_v4, %v2433_v40  ;;  %v3007_v4 = vld [vmem:[#allocation20_spill] sm:$0xff] }
 0x351   :  { %v2667_v8 = vadd.f32 %v1216_v6, %v1091_v60  ;;  %v1094_v22 = vadd.f32 %v1078_v13, %v982_v50  ;;  %v3004_v13 = vld [vmem:[#allocation29_spill] sm:$0xff]  ;;  %v3005_v60 = vld [vmem:[#allocation31_spill] sm:$0xff] }
 0x353   :  { %v2669_v28 = vadd.f32 %v1222_v29, %v1094_v22  ;;  %v1289_v49 = vpop.permute.xlu0 %1288 }
 0x354   :  { %v1220_v0 = vpop.permute.xlu1 %1219  ;;  %v1327_v46 = vmul.f32 %v1289_v49, %v2455_v30 }
 0x355   :  { %v2671_v21 = vadd.f32 %v1220_v0, %v1093_v20 }
 0x357   :  { %v1297_v18 = vpop.permute.xlu0 %1296 }
 0x365   :  { %v1257_v48 = vpop.permute.xlu1 %1256 }
 0x366   :  { %v1319_v44 = vmul.f32 %v1257_v48, %v2344_v42 }
 0x368   :  { %1351 = vrot.lane.b32.xlu0 %v1319_v44, %s1794_s1  ;;  %v3006_v44 = vld [vmem:[#allocation18_spill] sm:$0xff] }
 0x369   :  { %v1265_v43 = vpop.permute.xlu1 %1264 }
 0x36a   :  { %v1321_v35 = vmul.f32 %v1265_v43, %v2381_v23  ;;  %v491_v43 = vmul.f32 %v3007_v4, %v3006_v44 }
 0x36c   :  { %1355 = vrot.lane.b32.xlu1 %v1321_v35, %s1794_s1  ;;  %1420 = vperm.xlu0 %1709, %v1997_v32   ;;  %v1305_v32 = vpop.permute.xlu0 %1304  ;;  %v3008_v35 = vld [vmem:[#allocation55_spill] sm:$0xff] }
 0x36d   :  { %v1269_v38 = vpop.permute.xlu1 %1268  ;;  %v651_v49 = vadd.f32 %v3008_v35, %v491_v43  ;;  %v3016_v43 = vld [vmem:[#allocation33_spill] sm:$0xff]  ;;  %v3017_v35 = vld [vmem:[#allocation47_spill] sm:$0xff] }
 0x36e   :  { %v1322_v39 = vmul.f32 %v1269_v38, %v3002_v63 }
 0x370   :  { %1432 = vperm.xlu0 %1709, %v2019_v61   ;;  %1359 = vrot.lane.b32.xlu1 %v1323_v12, %s1794_s1  ;;  %v1329_v61 = vmul.f32 %v1297_v18, %v2518_v36  ;;  %v1313_v9 = vpop.permute.xlu0 %1312  ;;  %v3009_v12 = vld [vmem:[#allocation43_spill] sm:$0xff] }
 0x371   :  { %v1277_v17 = vpop.permute.xlu1 %1276 }
 0x374   :  { %1440 = vperm.xlu0 %1709, %v2039_v62   ;;  %1363 = vrot.lane.b32.xlu1 %v1325_v59, %s1794_s1  ;;  %v1331_v62 = vmul.f32 %v1305_v32, %v2565_v2  ;;  %v3010_v59 = vld [vmem:[#allocation56_spill] sm:$0xff] }
 0x375   :  { %v1285_v14 = vpop.permute.xlu1 %1284 }
 0x376   :  { %v1326_v50 = vmul.f32 %v1285_v14, %v3004_v13 }
 0x378   :  { %1448 = vperm.xlu0 %1709, %v2059_v1   ;;  %1367 = vrot.lane.b32.xlu1 %v1327_v46, %s1794_s1  ;;  %v1333_v1 = vmul.f32 %v1313_v9, %v2573_v25  ;;  %v3011_v46 = vld [vmem:[#allocation21_spill] sm:$0xff] }
 0x379   :  { %v1293_v27 = vpop.permute.xlu1 %1292  ;;  %v1067_v32 = vmul.f32 %v3011_v46, %v2405_v45 }
 0x37a   :  { %v1328_v6 = vmul.f32 %v1293_v27, %v3005_v60 }
 0x37c   :  { %1456 = vperm.xlu0 %1709, %v2079_v5   ;;  %1371 = vrot.lane.b32.xlu1 %v1329_v61, %s1794_s1  ;;  %v1320_v5 = vmul.f32 %v1261_v57, %v3001_v37  ;;  %v3013_v37 = vld [vmem:[#allocation12_spill] sm:$0xff] }
 0x37d   :  { %v1301_v15 = vpop.permute.xlu1 %1300 }
 0x37e   :  { %v1330_v31 = vmul.f32 %v1301_v15, %v2488_v34  ;;  %v3012_v15 = vld [vmem:[#allocation58_spill] sm:$0xff] }
 0x380   :  { %1464 = vperm.xlu0 %1709, %v2095_v7   ;;  %1375 = vrot.lane.b32.xlu1 %v1331_v62, %s1794_s1  ;;  %v3003_v7 = vld [vmem:[#allocation23_spill] sm:$0xff] }
 0x381   :  { %v1309_v16 = vpop.permute.xlu1 %1308  ;;  %v1324_v3 = vmul.f32 %v1277_v17, %v3003_v7  ;;  %v811_v17 = vadd.f32 %v3009_v12, %v651_v49 }
 0x382   :  { %v1332_v22 = vmul.f32 %v1309_v16, %v2494_v52 }
 0x383   :  { %v971_v18 = vadd.f32 %v3010_v59, %v811_v17 }
 0x384   :  { %1472 = vperm.xlu0 %1709, %v3000_v54   ;;  %1379 = vrot.lane.b32.xlu1 %v1333_v1, %s1794_s1 }
 0x385   :  { %v1317_v53 = vpop.permute.xlu1 %1316  ;;  %v1083_v27 = vadd.f32 %v1067_v32, %v971_v18 }
 0x386   :  { %v1334_v29 = vmul.f32 %v1317_v53, %v2497_v41  ;;  %v1726_v53 = vld [vmem:[#allocation4] sm:$0xff] }
 0x387   :  { %v1243_v62 = vadd.f32 %v3012_v15, %v1083_v27  ;;  %v3019_v27 = vld [vmem:[#allocation37_spill] sm:$0xff] }
 0x388   :  { %1353 = vrot.lane.b32.xlu0 %v1320_v5, %s1794_s1  ;;  %v487_v5 = vmul.f32 %v1726_v53, %v3013_v37 }
 0x38a   :  { %v1417_v10 = vpop.permute.xlu1 %1416 }
 0x38b   :  { %v1479_v11 = vmul.f32 %v1417_v10, %v2344_v42 }
 0x38c   :  { %1357 = vrot.lane.b32.xlu0 %v1322_v39, %s1794_s1 }
 0x38d   :  { %1511 = vrot.lane.b32.xlu1 %v1479_v11, %s1796_s7 }
 0x38e   :  { %v1425_v51 = vpop.permute.xlu1 %1424 }
 0x38f   :  { %v1481_v33 = vmul.f32 %v1425_v51, %v2381_v23 }
 0x390   :  { %1361 = vrot.lane.b32.xlu0 %v1324_v3, %s1794_s1  ;;  %v3014_v3 = vld [vmem:[#allocation40_spill] sm:$0xff] }
 0x391   :  { %1515 = vrot.lane.b32.xlu1 %v1481_v33, %s1796_s7  ;;  %v647_v51 = vadd.f32 %v3014_v3, %v487_v5  ;;  %v2739_v33 = vld [vmem:[#allocation4 + $0x18] sm:$0xff]  ;;  %v3021_v5 = vld [vmem:[#allocation49_spill] sm:$0xff] }
 0x392   :  { %v1429_v20 = vpop.permute.xlu1 %1428 }
 0x393   :  { %v1482_v12 = vmul.f32 %v1429_v20, %v3002_v63  ;;  %v3020_v63 = vld [vmem:[#allocation9_spill] sm:$0xff] }
 0x394   :  { %1365 = vrot.lane.b32.xlu0 %v1326_v50, %s1794_s1 }
 0x396   :  { %v1437_v0 = vpop.permute.xlu1 %1436 }
 0x398   :  { %1369 = vrot.lane.b32.xlu0 %v1328_v6, %s1794_s1  ;;  %v1728_v6 = vld [vmem:[#allocation4 + $0x20] sm:$0xff] }
 0x39a   :  { %v1445_v57 = vpop.permute.xlu1 %1444 }
 0x39c   :  { %1373 = vrot.lane.b32.xlu0 %v1330_v31, %s1794_s1  ;;  %v3015_v31 = vld [vmem:[#allocation11_spill] sm:$0xff] }
 0x39e   :  { %v1453_v55 = vpop.permute.xlu1 %1452 }
 0x3a0   :  { %1377 = vrot.lane.b32.xlu0 %v1332_v22, %s1794_s1  ;;  %v489_v22 = vmul.f32 %v1728_v6, %v3015_v31  ;;  %v1488_v6 = vmul.f32 %v1453_v55, %v3005_v60 }
 0x3a2   :  { %v2716_v48 = vpop.permute.xlu1 %1460  ;;  %v649_v49 = vadd.f32 %v3017_v35, %v489_v22 }
 0x3a4   :  { %1381 = vrot.lane.b32.xlu0 %v1334_v29, %s1794_s1  ;;  %v809_v15 = vadd.f32 %v3019_v27, %v649_v49  ;;  %v1729_v49 = vld [vmem:[#allocation4 + $0x10] sm:$0xff]  ;;  %v3027_v27 = vld [vmem:[#allocation16_spill] sm:$0xff] }
 0x3a6   :  { %v2721_v38 = vpop.permute.xlu1 %1468 }
 0x3aa   :  { %v2725_v14 = vpop.permute.xlu1 %1476 }
 0x3da   :  { %v1352_v54 = vpop.permute.xlu0 %1351 }
 0x3de   :  { %v1356_v61 = vpop.permute.xlu1 %1355 }
 0x3e2   :  { %v1360_v9 = vpop.permute.xlu1 %1359 }
 0x3e3   :  { %v2730_v16 = vadd.f32 %v1360_v9, %v1243_v62  ;;  %v1484_v62 = vmul.f32 %v1437_v0, %v3003_v7  ;;  %v3022_v0 = vld [vmem:[#allocation14_spill] sm:$0xff] }
 0x3e4   :  { %v1065_v3 = vmul.f32 %v3022_v0, %v2381_v23 }
 0x3e6   :  { %v2732_v1 = vpop.permute.xlu1 %1363 }
 0x3ea   :  { %v1368_v39 = vpop.permute.xlu1 %1367 }
 0x3eb   :  { %v2736_v10 = vadd.f32 %v1368_v39, %v2626_v24  ;;  %v1421_v11 = vpop.permute.xlu0 %1420  ;;  %v807_v24 = vadd.f32 %v3016_v43, %v647_v51  ;;  %v969_v39 = vadd.f32 %v3021_v5, %v809_v15  ;;  %v3023_v51 = vld [vmem:[#allocation44_spill] sm:$0xff] }
 0x3ec   :  { %v1480_v50 = vmul.f32 %v2739_v33, %v1421_v11  ;;  %v1486_v11 = vmul.f32 %v1445_v57, %v3004_v13  ;;  %v3024_v13 = vld [vmem:[#allocation51_spill] sm:$0xff] }
 0x3ee   :  { %v1372_v29 = vpop.permute.xlu1 %1371  ;;  %1513 = vrot.lane.b32.xlu0 %v1480_v50, %s1796_s7 }
 0x3ef   :  { %v2745_v44 = vadd.f32 %v1372_v29, %v2643_v47  ;;  %v1433_v4 = vpop.permute.xlu0 %1432  ;;  %v3018_v47 = vld [vmem:[#allocation42_spill] sm:$0xff]  ;;  %v1490_v29 = vmul.f32 %v2716_v48, %v2488_v34 }
 0x3f0   :  { %v1483_v17 = vmul.f32 %v1433_v4, %v2405_v45  ;;  %v967_v32 = vadd.f32 %v3018_v47, %v807_v24  ;;  %v1063_v45 = vmul.f32 %v3020_v63, %v2344_v42 }
 0x3f2   :  { %v1376_v59 = vpop.permute.xlu1 %1375  ;;  %1517 = vrot.lane.b32.xlu0 %v1482_v12, %s1796_s7  ;;  %1519 = vrot.lane.b32.xlu1 %v1483_v17, %s1796_s7  ;;  %v1079_v37 = vadd.f32 %v1063_v45, %v967_v32  ;;  %v3025_v12 = vld [vmem:[#allocation10_spill] sm:$0xff] }
 0x3f3   :  { %v2754_v18 = vadd.f32 %v1376_v59, %v2667_v8  ;;  %v1441_v46 = vpop.permute.xlu0 %1440  ;;  %v488_v17 = vmul.f32 %v1729_v49, %v3025_v12  ;;  %v3026_v59 = vld [vmem:[#allocation34_spill] sm:$0xff]  ;;  %v3044_v49 = vld [vmem:[#allocation48_spill] sm:$0xff] }
 0x3f4   :  { %v1485_v9 = vmul.f32 %v1441_v46, %v2433_v40  ;;  %v1239_v50 = vadd.f32 %v3023_v51, %v1079_v37  ;;  %v1730_v32 = vld [vmem:[#allocation4 + $0x30] sm:$0xff]  ;;  %v3035_v51 = vld [vmem:[#allocation45_spill] sm:$0xff] }
 0x3f5   :  { %v648_v46 = vadd.f32 %v3026_v59, %v488_v17  ;;  %v490_v15 = vmul.f32 %v1730_v32, %v3027_v27  ;;  %v3030_v45 = vld [vmem:[#allocation38_spill] sm:$0xff]  ;;  %v3047_v27 = vld [vmem:[#allocation36_spill] sm:$0xff] }
 0x3f6   :  { %v1380_v20 = vpop.permute.xlu1 %1379  ;;  %1521 = vrot.lane.b32.xlu0 %v1484_v62, %s1796_s7  ;;  %1523 = vrot.lane.b32.xlu1 %v1485_v9, %s1796_s7  ;;  %v1399_v22 = vadd.f32 %v1352_v54, %v1239_v50  ;;  %v1492_v54 = vmul.f32 %v2721_v38, %v2494_v52  ;;  %v1731_v62 = vld [vmem:[#allocation4 + $0x60] sm:$0xff]  ;;  %v3029_v9 = vld [vmem:[#allocation25_spill] sm:$0xff]  ;;  %v3031_v37 = vld [vmem:[#allocation22_spill] sm:$0xff] }
 0x3f7   :  { %v2765_v8 = vadd.f32 %v1380_v20, %v2671_v21  ;;  %v1449_v53 = vpop.permute.xlu0 %1448  ;;  %v1081_v21 = vadd.f32 %v1065_v3, %v969_v39  ;;  %v493_v63 = vmul.f32 %v1731_v62, %v3029_v9  ;;  %v650_v20 = vadd.f32 %v3030_v45, %v490_v15  ;;  %v3032_v39 = vld [vmem:[#allocation61_spill] sm:$0xff]  ;;  %v3045_v17 = vld [vmem:[#allocation62_spill] sm:$0xff]  ;;  %v1734_v9 = vld [vmem:[#allocation4 + $0x58] sm:$0xff] }
 0x3f8   :  { %v1487_v7 = vmul.f32 %v1449_v53, %v2455_v30  ;;  %v1732_v53 = vld [vmem:[#allocation4 + $0x50] sm:$0xff]  ;;  %v3034_v3 = vld [vmem:[#allocation53_spill] sm:$0xff] }
 0x3f9   :  { %v1241_v57 = vadd.f32 %v3024_v13, %v1081_v21  ;;  %v492_v5 = vmul.f32 %v1732_v53, %v3031_v37 }
 0x3fa   :  { %1525 = vrot.lane.b32.xlu0 %v1486_v11, %s1796_s7  ;;  %1527 = vrot.lane.b32.xlu1 %v1487_v7, %s1796_s7  ;;  %v653_v11 = vadd.f32 %v3032_v39, %v493_v63  ;;  %v3033_v7 = vld [vmem:[#allocation35_spill] sm:$0xff]  ;;  %v3049_v63 = vld [vmem:[#allocation24_spill] sm:$0xff]  ;;  %v3050_v39 = vld [vmem:[#allocation57_spill] sm:$0xff] }
 0x3fb   :  { %v1457_v42 = vpop.permute.xlu0 %1456  ;;  %v1401_v24 = vadd.f32 %v1356_v61, %v1241_v57  ;;  %v652_v50 = vadd.f32 %v3035_v51, %v492_v5  ;;  %v3039_v57 = vld [vmem:[#allocation28_spill] sm:$0xff]  ;;  %v1068_v45 = vmul.f32 %v1734_v9, %v3049_v63  ;;  %v3052_v51 = vld [vmem:[#allocation30_spill] sm:$0xff] }
 0x3fc   :  { %v1489_v31 = vmul.f32 %v1457_v42, %v2518_v36  ;;  %v810_v42 = vadd.f32 %v3034_v3, %v650_v20 }
 0x3fe   :  { %1529 = vrot.lane.b32.xlu0 %v1488_v6, %s1796_s7  ;;  %1531 = vrot.lane.b32.xlu1 %v1489_v31, %s1796_s7  ;;  %v3036_v6 = vld [vmem:[#allocation15_spill] sm:$0xff] }
 0x3ff   :  { %v1512_v30 = vpop.permute.xlu1 %1511  ;;  %v1465_v23 = vpop.permute.xlu0 %1464  ;;  %v1064_v31 = vmul.f32 %v2739_v33, %v3036_v6 }
 0x400   :  { %v1559_v4 = vadd.f32 %v1512_v30, %v1399_v22  ;;  %v1491_v43 = vmul.f32 %v1465_v23, %v2565_v2  ;;  %v1494_v2 = vmul.f32 %v2725_v14, %v2497_v41  ;;  %v3028_v41 = vld [vmem:[#allocation46_spill] sm:$0xff]  ;;  %v3037_v22 = vld [vmem:[#allocation60_spill] sm:$0xff] }
 0x401   :  { %v808_v14 = vadd.f32 %v3028_v41, %v648_v46  ;;  %v812_v30 = vadd.f32 %v3037_v22, %v652_v50  ;;  %v3038_v23 = vld [vmem:[#allocation52_spill] sm:$0xff]  ;;  %v3046_v46 = vld [vmem:[#allocation65_spill] sm:$0xff] }
 0x402   :  { %1576 = vst.msk [vmem:[%s2921_s2] sm:$0xff] %vm1575_vm4, %v1559_v4  ;;  %1533 = vrot.lane.b32.xlu0 %v1490_v29, %s1796_s7  ;;  %1535 = vrot.lane.b32.xlu1 %v1491_v43, %s1796_s7  ;;  %v813_v13 = vadd.f32 %v3038_v23, %v653_v11  ;;  %v3040_v29 = vld [vmem:[#allocation27_spill] sm:$0xff] }
 0x403   :  { %v1516_v36 = vpop.permute.xlu1 %1515  ;;  %v1473_v55 = vpop.permute.xlu0 %1472  ;;  %v968_v0 = vadd.f32 %v3033_v7, %v808_v14  ;;  %v494_v4 = vmul.f32 %v3040_v29, %v3039_v57  ;;  %v3041_v43 = vld [vmem:[#allocation39_spill] sm:$0xff]  ;;  %v972_v12 = vadd.f32 %v3044_v49, %v812_v30  ;;  %v3048_v14 = vld [vmem:[#allocation26_spill] sm:$0xff]  ;;  %v3051_v7 = vld [vmem:[#allocation41_spill] sm:$0xff] }
 0x404   :  { %v1561_v35 = vadd.f32 %v1516_v36, %v1401_v24  ;;  %v1493_v34 = vmul.f32 %v1473_v55, %v2573_v25  ;;  %v970_v24 = vadd.f32 %v3041_v43, %v810_v42  ;;  %v1733_v55 = vld [vmem:[#allocation4 + $0x38] sm:$0xff]  ;;  %v973_v59 = vadd.f32 %v3045_v17, %v813_v13  ;;  %v3055_v13 = vld [vmem:[#allocation64_spill] sm:$0xff] }
 0x405   :  { %v1080_v36 = vadd.f32 %v1064_v31, %v968_v0  ;;  %v1069_v62 = vmul.f32 %v3048_v14, %v2433_v40  ;;  %v1084_v37 = vadd.f32 %v1068_v45, %v972_v12  ;;  %v1735_v42 = vld [vmem:[#allocation4 + $0x78] sm:$0xff]  ;;  %v976_v57 = vadd.f32 %v3055_v13, %v2629_v58 }
 0x406   :  { %1578 = vst.msk [vmem:[%s2921_s2 + $0x10] sm:$0xff] %vm1575_vm4, %v1561_v35  ;;  %1537 = vrot.lane.b32.xlu0 %v1492_v54, %s1796_s7  ;;  %1539 = vrot.lane.b32.xlu1 %v1493_v34, %s1796_s7  ;;  %v3042_v54 = vld [vmem:[#allocation19_spill] sm:$0xff]  ;;  %v3043_v34 = vld [vmem:[#allocation54_spill] sm:$0xff]  ;;  %v1070_v50 = vmul.f32 %v1735_v42, %v3052_v51 }
 0x407   :  { %v1354_v48 = vpop.permute.xlu0 %1353  ;;  %v1066_v35 = vmul.f32 %v1733_v55, %v3042_v54  ;;  %v1240_v15 = vadd.f32 %v3047_v27, %v1080_v36  ;;  %v1085_v53 = vadd.f32 %v1069_v62, %v973_v59  ;;  %v3053_v40 = vld [vmem:[#allocation63_spill] sm:$0xff] }
 0x409   :  { %v1082_v41 = vadd.f32 %v1066_v35, %v970_v24  ;;  %v1400_v20 = vadd.f32 %v1354_v48, %v1240_v15  ;;  %v1245_v31 = vadd.f32 %v3053_v40, %v1085_v53  ;;  %v3054_v48 = vld [vmem:[#allocation50_spill] sm:$0xff] }
 0x40a   :  { %1541 = vrot.lane.b32.xlu0 %v1494_v2, %s1796_s7  ;;  %v654_v2 = vadd.f32 %v3043_v34, %v494_v4  ;;  %v1244_v22 = vadd.f32 %v3054_v48, %v1084_v37 }
 0x40b   :  { %v1358_v61 = vpop.permute.xlu0 %1357  ;;  %v1242_v0 = vadd.f32 %v3051_v7, %v1082_v41  ;;  %v1405_v36 = vadd.f32 %v2732_v1, %v1245_v31 }
 0x40c   :  { %v814_v32 = vadd.f32 %v3046_v46, %v654_v2 }
 0x40d   :  { %v1402_v6 = vadd.f32 %v1358_v61, %v1242_v0  ;;  %v3056_v61 = vld [vmem:[#allocation32_spill] sm:$0xff] }
 0x40e   :  { %v974_v11 = vadd.f32 %v3050_v39, %v814_v32  ;;  %v1072_v24 = vmul.f32 %v3056_v61, %v3005_v60 }
 0x40f   :  { %v1362_v52 = vpop.permute.xlu0 %1361 }
 0x410   :  { %v1086_v29 = vadd.f32 %v1070_v50, %v974_v11  ;;  %v1404_v55 = vadd.f32 %v1362_v52, %v1244_v22  ;;  %v1088_v34 = vadd.f32 %v1072_v24, %v976_v57 }
 0x412   :  { %v1248_v12 = vadd.f32 %v2617_v26, %v1088_v34 }
 0x413   :  { %v2801_v38 = vpop.permute.xlu0 %1365 }
 0x417   :  { %v2803_v25 = vpop.permute.xlu0 %1369 }
 0x418   :  { %v1408_v46 = vadd.f32 %v2803_v25, %v1248_v12 }
 0x41b   :  { %v2807_v47 = vpop.permute.xlu0 %1373 }
 0x41f   :  { %v2818_v21 = vpop.permute.xlu0 %1377 }
 0x423   :  { %v2831_v33 = vpop.permute.xlu0 %1381 }
 0x460   :  { %v1514_v5 = vpop.permute.xlu0 %1513 }
 0x461   :  { %v1560_v3 = vadd.f32 %v1514_v5, %v1400_v20 }
 0x463   :  { %1577 = vst.msk [vmem:[%s2921_s2 + $0x8] sm:$0xff] %vm1575_vm4, %v1560_v3 }
 0x464   :  { %v1520_v30 = vpop.permute.xlu1 %1519  ;;  %v1518_v23 = vpop.permute.xlu0 %1517 }
 0x465   :  { %v1563_v4 = vadd.f32 %v1520_v30, %v2730_v16  ;;  %v1562_v43 = vadd.f32 %v1518_v23, %v1402_v6  ;;  %v3057_v16 = vld [vmem:[#allocation59_spill] sm:$0xff] }
 0x466   :  { %v1246_v35 = vadd.f32 %v3057_v16, %v1086_v29 }
 0x467   :  { %1580 = vst.msk [vmem:[%s2921_s2 + $0x20] sm:$0xff] %vm1575_vm4, %v1563_v4  ;;  %1579 = vst.msk [vmem:[%s2921_s2 + $0x18] sm:$0xff] %vm1575_vm4, %v1562_v43 }
 0x468   :  { %v1524_v58 = vpop.permute.xlu1 %1523  ;;  %v1522_v54 = vpop.permute.xlu0 %1521  ;;  %v1406_v1 = vadd.f32 %v2801_v38, %v1246_v35 }
 0x469   :  { %v1565_v2 = vadd.f32 %v1524_v58, %v1405_v36  ;;  %v1564_v60 = vadd.f32 %v1522_v54, %v1404_v55 }
 0x46b   :  { %1582 = vst.msk [vmem:[%s2921_s2 + $0x30] sm:$0xff] %vm1575_vm4, %v1565_v2  ;;  %1581 = vst.msk [vmem:[%s2921_s2 + $0x28] sm:$0xff] %vm1575_vm4, %v1564_v60 }
 0x46c   :  { %v1528_v52 = vpop.permute.xlu1 %1527  ;;  %v1526_v49 = vpop.permute.xlu0 %1525 }
 0x46d   :  { %v1567_v17 = vadd.f32 %v1528_v52, %v2736_v10  ;;  %v1566_v59 = vadd.f32 %v1526_v49, %v1406_v1  ;;  %v1410_v10 = vadd.f32 %v2807_v47, %v2649_v56 }
 0x46f   :  { %1584 = vst.msk [vmem:[%s2921_s2 + $0x40] sm:$0xff] %vm1575_vm4, %v1567_v17  ;;  %1583 = vst.msk [vmem:[%s2921_s2 + $0x38] sm:$0xff] %vm1575_vm4, %v1566_v59 }
 0x470   :  { %v1532_v38 = vpop.permute.xlu1 %1531  ;;  %v1530_v32 = vpop.permute.xlu0 %1529 }
 0x471   :  { %v1569_v27 = vadd.f32 %v1532_v38, %v2745_v44  ;;  %v1568_v26 = vadd.f32 %v1530_v32, %v1408_v46  ;;  %v1412_v44 = vadd.f32 %v2818_v21, %v2657_v19 }
 0x473   :  { %1586 = vst.msk [vmem:[%s2921_s2 + $0x50] sm:$0xff] %vm1575_vm4, %v1569_v27  ;;  %1585 = vst.msk [vmem:[%s2921_s2 + $0x48] sm:$0xff] %vm1575_vm4, %v1568_v26 }
 0x474   :  { %v1536_v25 = vpop.permute.xlu1 %1535  ;;  %v1534_v15 = vpop.permute.xlu0 %1533 }
 0x475   :  { %v1571_v41 = vadd.f32 %v1536_v25, %v2754_v18  ;;  %v1570_v14 = vadd.f32 %v1534_v15, %v1410_v10  ;;  %v1414_v18 = vadd.f32 %v2831_v33, %v2669_v28 }
 0x477   :  { %1588 = vst.msk [vmem:[%s2921_s2 + $0x60] sm:$0xff] %vm1575_vm4, %v1571_v41  ;;  %1587 = vst.msk [vmem:[%s2921_s2 + $0x58] sm:$0xff] %vm1575_vm4, %v1570_v14 }
 0x478   :  { %v1540_v56 = vpop.permute.xlu1 %1539  ;;  %v1538_v47 = vpop.permute.xlu0 %1537 }
 0x479   :  { %v1573_v62 = vadd.f32 %v1540_v56, %v2765_v8  ;;  %v1572_v9 = vadd.f32 %v1538_v47, %v1412_v44 }
 0x47b   :  { %1590 = vst.msk [vmem:[%s2921_s2 + $0x70] sm:$0xff] %vm1575_vm4, %v1573_v62  ;;  %1589 = vst.msk [vmem:[%s2921_s2 + $0x68] sm:$0xff] %vm1575_vm4, %v1572_v9 }
 0x47c   :  { %v1542_v19 = vpop.permute.xlu0 %1541 }
 0x47d   :  { %v1574_v21 = vadd.f32 %v1542_v19, %v1414_v18 }
 0x47f   :  { %1591 = vst.msk [vmem:[%s2921_s2 + $0x78] sm:$0xff] %vm1575_vm4, %v1574_v21 }
 0x480   :  { %1596 = vsyncpa [#allocation3], 1 }
 0x481   :  { %1597 = vsyncpa [#allocation5], 1 }

</bundles_post_ra>
